<compile_context>
chip_gen: v7x
topology: tpu7x:2x2x1
jax: 0.10.0
libtpu: 0.0.40
codegen_flags: <defaults>
</compile_context>

<pallas_src>
import functools

import jax
import jax.numpy as jnp
from jax.experimental import pallas as pl
from jax.experimental.pallas import tpu as pltpu


def _cloud_lstm_kernel(x_ref, mask_ref, h0_ref, c0_ref,
                       w_ih_ref, w_hh_ref, b_ref, fcw_ref, fcb_ref,
                       out_ref, rnn_ref, hn_ref, cn_ref,
                       pre_ref, *, pad_value):
    """One batch-tile of the CLOUD forward pass, entirely in VMEM.

    Refs (Bt = batch tile):
      x_ref    : (S, Bt, 1)   inputs ("embedded" char index as float, n_embedd=1)
      mask_ref : (S, Bt, 1)   f32 {0,1} validity mask (t < length)
      h0/c0    : (Bt, H)      initial LSTM state
      w_ih     : (1, 4H)      input->gates weights (transposed)
      w_hh     : (H, 4H)      hidden->gates weights (transposed)
      b        : (1, 4H)      b_ih + b_hh
      fcw      : (H, Vp)      fc weight (transposed, V padded to 128), fcb: (1, Vp)
      out_ref  : (S, Bt, Vp)  logits (lane-dense), rnn_ref: (S, Bt, H), hn/cn: (Bt, H)
      pre_ref  : (S, Bt, 4H)  VMEM scratch: precomputed input contribution + bias
    """
    S = x_ref.shape[0]
    H = h0_ref.shape[1]

    # ---- Prologue (off the serial chain): x_t * W_ih + b for every timestep.
    pre_ref[...] = x_ref[...] * w_ih_ref[...] + b_ref[...]

    # Hoist the recurrent weight load out of the loop.
    w_hh = w_hh_ref[...]

    def step(t, carry):
        h, c = carry
        gates = pre_ref[t] + jnp.dot(h, w_hh, preferred_element_type=jnp.float32)
        i = jax.nn.sigmoid(gates[:, 0:H])          # PyTorch gate order: i, f, g, o
        f = jax.nn.sigmoid(gates[:, H:2 * H])
        g = jnp.tanh(gates[:, 2 * H:3 * H])
        o = jax.nn.sigmoid(gates[:, 3 * H:4 * H])
        c_new = f * c + i * g
        h_new = o * jnp.tanh(c_new)

        m = mask_ref[t]                            # (Bt, 1) f32 in {0, 1}
        h_keep = h + m * (h_new - h)               # freeze state past sequence length
        c_keep = c + m * (c_new - c)
        rnn_ref[t] = m * h_new + (1.0 - m) * pad_value   # pad_packed_sequence value
        return (h_keep, c_keep)

    # Fully unrolled: S is small & static; gives LLO visibility across steps.
    h_fin, c_fin = jax.lax.fori_loop(0, S, step, (h0_ref[...], c0_ref[...]),
                                     unroll=True)
    hn_ref[...] = h_fin
    cn_ref[...] = c_fin

    # ---- Epilogue: fc projection hoisted out of the recurrence.
    # S independent MXU dots (pipelined, off the dependent chain) with
    # lane-dense (Vp multiple of 128) stores.
    fcw = fcw_ref[...]
    fcb = fcb_ref[...]
    for s in range(S):
        out_ref[s] = (jnp.dot(rnn_ref[s], fcw,
                              preferred_element_type=jnp.float32) + fcb)


def cloud_forward(X, X_lengths, hidden, params, pad_idx=0):
    """JAX/Pallas equivalent of CLOUD.forward (n_embedd=1, n_layers=1, drop_rate=0).

    Returns (out, out_rnn, (h_n, c_n)) with the same shapes as the PyTorch module:
      out     : (B*S, V)
      out_rnn : (B, S, H)
      h_n/c_n : (1, B, H)
    """
    h0, c0 = hidden
    B, S = X.shape
    H = params["w_hh"].shape[1]
    V = params["fc_w"].shape[0]
    Vp = ((V + 127) // 128) * 128                 # lane-dense logits width

    # --- batch tiling (megacore-ready grid; single block at toy sizes) ---
    if B <= 8:
        bt, Bp = B, B
    else:
        bt = 8
        Bp = ((B + 7) // 8) * 8
    grid = (Bp // bt,)

    # --- glue: layout / parameter prep (plain JAX) ---
    Xf = X.astype(jnp.float32)
    lens = X_lengths.astype(jnp.int32)
    h0b, c0b = h0[0], c0[0]
    if Bp != B:
        Xf = jnp.pad(Xf, ((0, Bp - B), (0, 0)))
        lens = jnp.pad(lens, (0, Bp - B))         # padded rows: length 0 -> fully masked
        h0b = jnp.pad(h0b, ((0, Bp - B), (0, 0)))
        c0b = jnp.pad(c0b, ((0, Bp - B), (0, 0)))

    x_sb = jnp.transpose(Xf, (1, 0))[..., None]                        # (S, Bp, 1)
    mask = (jnp.arange(S, dtype=jnp.int32)[:, None, None]
            < lens[None, :, None]).astype(jnp.float32)                 # (S, Bp, 1)
    w_ih_t = params["w_ih"].T                                          # (1, 4H)
    w_hh_t = params["w_hh"].T                                          # (H, 4H)
    b = (params["b_ih"] + params["b_hh"])[None, :]                     # (1, 4H)
    fc_w_p = jnp.pad(params["fc_w"].T, ((0, 0), (0, Vp - V)))          # (H, Vp)
    fc_b_p = jnp.pad(params["fc_b"], (0, Vp - V))[None, :]             # (1, Vp)

    kernel = functools.partial(_cloud_lstm_kernel, pad_value=float(pad_idx))

    grid_spec = pltpu.PrefetchScalarGridSpec(
        num_scalar_prefetch=0,
        grid=grid,
        in_specs=[
            pl.BlockSpec((S, bt, 1), lambda i: (0, i, 0)),    # x
            pl.BlockSpec((S, bt, 1), lambda i: (0, i, 0)),    # mask
            pl.BlockSpec((bt, H), lambda i: (i, 0)),          # h0
            pl.BlockSpec((bt, H), lambda i: (i, 0)),          # c0
            pl.BlockSpec((1, 4 * H), lambda i: (0, 0)),       # w_ih^T
            pl.BlockSpec((H, 4 * H), lambda i: (0, 0)),       # w_hh^T
            pl.BlockSpec((1, 4 * H), lambda i: (0, 0)),       # b_ih + b_hh
            pl.BlockSpec((H, Vp), lambda i: (0, 0)),          # fc_w^T (padded)
            pl.BlockSpec((1, Vp), lambda i: (0, 0)),          # fc_b (padded)
        ],
        out_specs=(
            pl.BlockSpec((S, bt, Vp), lambda i: (0, i, 0)),   # logits
            pl.BlockSpec((S, bt, H), lambda i: (0, i, 0)),    # rnn states
            pl.BlockSpec((bt, H), lambda i: (i, 0)),          # h_n
            pl.BlockSpec((bt, H), lambda i: (i, 0)),          # c_n
        ),
        scratch_shapes=[pltpu.VMEM((S, bt, 4 * H), jnp.float32)],      # pre
    )

    out_sbv, rnn_sbh, h_n, c_n = pl.pallas_call(
        kernel,
        out_shape=(
            jax.ShapeDtypeStruct((S, Bp, Vp), jnp.float32),
            jax.ShapeDtypeStruct((S, Bp, H), jnp.float32),
            jax.ShapeDtypeStruct((Bp, H), jnp.float32),
            jax.ShapeDtypeStruct((Bp, H), jnp.float32),
        ),
        grid_spec=grid_spec,
        compiler_params=pltpu.CompilerParams(
            dimension_semantics=("parallel",)),
    )(x_sb, mask, h0b, c0b, w_ih_t, w_hh_t, b, fc_w_p, fc_b_p)

    # Back to PyTorch's batch-first convention (tiny data; at scale this transpose
    # would be expressed through the out BlockSpec index_map instead).
    out_rnn = jnp.transpose(rnn_sbh[:, :B, :], (1, 0, 2))              # (B, S, H)
    out = jnp.transpose(out_sbv[:, :B, :V], (1, 0, 2)).reshape(B * S, V)
    return out, out_rnn, (h_n[:B][None], c_n[:B][None])


def _ref_forward(X, X_lengths, hidden, params, pad_idx=0):
    """Pure-JAX reference reproducing the PyTorch semantics (for verification)."""
    h0, c0 = hidden
    B, S = X.shape
    H = params["w_hh"].shape[1]
    h, c = h0[0], c0[0]
    x = X.astype(jnp.float32)[..., None]                               # (B, S, 1)
    outs = []
    for t in range(S):
        gates = (x[:, t] @ params["w_ih"].T + h @ params["w_hh"].T
                 + params["b_ih"] + params["b_hh"])
        i = jax.nn.sigmoid(gates[:, :H])
        f = jax.nn.sigmoid(gates[:, H:2 * H])
        g = jnp.tanh(gates[:, 2 * H:3 * H])
        o = jax.nn.sigmoid(gates[:, 3 * H:])
        c_new = f * c + i * g
        h_new = o * jnp.tanh(c_new)
        m = (t < X_lengths)[:, None]
        h = jnp.where(m, h_new, h)
        c = jnp.where(m, c_new, c)
        outs.append(jnp.where(m, h_new, float(pad_idx)))
    out_rnn = jnp.stack(outs, axis=1)                                  # (B, S, H)
    out = out_rnn.reshape(B * S, H) @ params["fc_w"].T + params["fc_b"]
    return out, out_rnn, (h[None], c[None])


if __name__ == "__main__":
    # Small shapes consistent with the module defaults (n_embedd=1, n_layers=1).
    VOCAB, H, B, S, PAD_IDX = 16, 32, 2, 8, 0

    key = jax.random.PRNGKey(0)
    kx, k1, k2, k3, k4, k5, k6 = jax.random.split(key, 7)

    # Deterministic "PyTorch-style" uniform(-1/sqrt(H), 1/sqrt(H)) init.
    bound = 1.0 / jnp.sqrt(jnp.float32(H))
    params = {
        "w_ih": jax.random.uniform(k1, (4 * H, 1), jnp.float32, -bound, bound),
        "w_hh": jax.random.uniform(k2, (4 * H, H), jnp.float32, -bound, bound),
        "b_ih": jax.random.uniform(k3, (4 * H,), jnp.float32, -bound, bound),
        "b_hh": jax.random.uniform(k4, (4 * H,), jnp.float32, -bound, bound),
        "fc_w": jax.random.uniform(k5, (VOCAB, H), jnp.float32, -bound, bound),
        "fc_b": jax.random.uniform(k6, (VOCAB,), jnp.float32, -bound, bound),
    }

    X = jax.random.randint(kx, (B, S), 0, VOCAB, dtype=jnp.int32)
    X_lengths = jnp.array([S, 5], dtype=jnp.int32)   # sorted descending, as pack_padded_sequence requires
    hidden = (jnp.zeros((1, B, H), jnp.float32),
              jnp.zeros((1, B, H), jnp.float32))     # init_hidden

    out, out_rnn, (h_n, c_n) = cloud_forward(X, X_lengths, hidden, params, pad_idx=PAD_IDX)
    jax.block_until_ready((out, out_rnn, h_n, c_n))

    ro, rrnn, (rh, rc) = _ref_forward(X, X_lengths, hidden, params, pad_idx=PAD_IDX)
    assert out.shape == (B * S, VOCAB) and out_rnn.shape == (B, S, H)
    assert h_n.shape == (1, B, H) and c_n.shape == (1, B, H)
    assert jnp.allclose(out, ro, atol=2e-3, rtol=2e-3)
    assert jnp.allclose(out_rnn, rrnn, atol=2e-3, rtol=2e-3)
    assert jnp.allclose(h_n, rh, atol=2e-3, rtol=2e-3)
    assert jnp.allclose(c_n, rc, atol=2e-3, rtol=2e-3)

    print("KERNEL_OK")
</pallas_src>

<mosaic_0001>
module attributes {stable_mosaic.version = 11 : i64} {
  func.func @_cloud_lstm_kernel(%arg0: i32, %arg1: memref<8x2x1xf32, #tpu.memory_space<vmem>>, %arg2: memref<8x2x1xf32, #tpu.memory_space<vmem>>, %arg3: memref<2x32xf32, #tpu.memory_space<vmem>>, %arg4: memref<2x32xf32, #tpu.memory_space<vmem>>, %arg5: memref<1x128xf32, #tpu.memory_space<vmem>>, %arg6: memref<32x128xf32, #tpu.memory_space<vmem>>, %arg7: memref<1x128xf32, #tpu.memory_space<vmem>>, %arg8: memref<32x128xf32, #tpu.memory_space<vmem>>, %arg9: memref<1x128xf32, #tpu.memory_space<vmem>>, %arg10: memref<8x2x128xf32, #tpu.memory_space<vmem>>, %arg11: memref<8x2x32xf32, #tpu.memory_space<vmem>>, %arg12: memref<2x32xf32, #tpu.memory_space<vmem>>, %arg13: memref<2x32xf32, #tpu.memory_space<vmem>>, %arg14: memref<8x2x128xf32, #tpu.memory_space<vmem>>) attributes {dimension_semantics = [#tpu.dimension_semantics<parallel>], iteration_bounds = array<i64: 1>, scalar_prefetch = 0 : i64, scratch_operands = 1 : i64, tpu.core_type = #tpu.core_type<tc>, window_params = [{transform_indices = @transform_0, window_bounds = array<i64: 8, 2, 1>}, {transform_indices = @transform_1, window_bounds = array<i64: 8, 2, 1>}, {transform_indices = @transform_2, window_bounds = array<i64: 2, 32>}, {transform_indices = @transform_3, window_bounds = array<i64: 2, 32>}, {pipeline_mode = #tpu.pipeline_mode<synchronous>, transform_indices = @transform_4, window_bounds = array<i64: 1, 128>}, {pipeline_mode = #tpu.pipeline_mode<synchronous>, transform_indices = @transform_5, window_bounds = array<i64: 32, 128>}, {pipeline_mode = #tpu.pipeline_mode<synchronous>, transform_indices = @transform_6, window_bounds = array<i64: 1, 128>}, {pipeline_mode = #tpu.pipeline_mode<synchronous>, transform_indices = @transform_7, window_bounds = array<i64: 32, 128>}, {pipeline_mode = #tpu.pipeline_mode<synchronous>, transform_indices = @transform_8, window_bounds = array<i64: 1, 128>}, {transform_indices = @transform_9, window_bounds = array<i64: 8, 2, 128>}, {transform_indices = @transform_10, window_bounds = array<i64: 8, 2, 32>}, {transform_indices = @transform_11, window_bounds = array<i64: 2, 32>}, {transform_indices = @transform_12, window_bounds = array<i64: 2, 32>}]} {
    %c0 = arith.constant 0 : index
    %c0_0 = arith.constant 0 : index
    %c0_1 = arith.constant 0 : index
    %0 = vector.load %arg1[%c0, %c0_0, %c0_1] : memref<8x2x1xf32, #tpu.memory_space<vmem>>, vector<8x2x1xf32>
    %c0_2 = arith.constant 0 : index
    %c0_3 = arith.constant 0 : index
    %1 = vector.load %arg5[%c0_2, %c0_3] : memref<1x128xf32, #tpu.memory_space<vmem>>, vector<1x128xf32>
    %2 = vector.shape_cast %1 : vector<1x128xf32> to vector<1x1x128xf32>
    %3 = vector.broadcast %0 : vector<8x2x1xf32> to vector<8x2x128xf32>
    %4 = vector.broadcast %2 : vector<1x1x128xf32> to vector<8x2x128xf32>
    %5 = arith.mulf %3, %4 : vector<8x2x128xf32>
    %c0_4 = arith.constant 0 : index
    %c0_5 = arith.constant 0 : index
    %6 = vector.load %arg7[%c0_4, %c0_5] : memref<1x128xf32, #tpu.memory_space<vmem>>, vector<1x128xf32>
    %7 = vector.shape_cast %6 : vector<1x128xf32> to vector<1x1x128xf32>
    %8 = vector.broadcast %7 : vector<1x1x128xf32> to vector<8x2x128xf32>
    %9 = arith.addf %5, %8 : vector<8x2x128xf32>
    %c0_6 = arith.constant 0 : index
    %c0_7 = arith.constant 0 : index
    %c0_8 = arith.constant 0 : index
    %10 = vector.load %arg14[%c0_6, %c0_7, %c0_8] : memref<8x2x128xf32, #tpu.memory_space<vmem>>, vector<8x2x128xf32>
    tpu.vector_store %arg14[%c0_6, %c0_7, %c0_8], %9 {strides = array<i32>} : memref<8x2x128xf32, #tpu.memory_space<vmem>>, vector<8x2x128xf32>,
    %c0_9 = arith.constant 0 : index
    %c0_10 = arith.constant 0 : index
    %11 = vector.load %arg6[%c0_9, %c0_10] : memref<32x128xf32, #tpu.memory_space<vmem>>, vector<32x128xf32>
    %c0_11 = arith.constant 0 : index
    %c0_12 = arith.constant 0 : index
    %12 = vector.load %arg3[%c0_11, %c0_12] : memref<2x32xf32, #tpu.memory_space<vmem>>, vector<2x32xf32>
    %c0_13 = arith.constant 0 : index
    %c0_14 = arith.constant 0 : index
    %13 = vector.load %arg4[%c0_13, %c0_14] : memref<2x32xf32, #tpu.memory_space<vmem>>, vector<2x32xf32>
    %c0_i32 = arith.constant 0 : i32
    %14 = arith.index_cast %c0_i32 : i32 to index
    %c0_15 = arith.constant 0 : index
    %c0_16 = arith.constant 0 : index
    %15 = vector.load %arg14[%14, %c0_15, %c0_16] : memref<8x2x128xf32, #tpu.memory_space<vmem>>, vector<1x2x128xf32>
    %16 = vector.shape_cast %15 : vector<1x2x128xf32> to vector<2x128xf32>
    %cst = arith.constant dense<0.000000e+00> : vector<2x128xf32>
    %17 = tpu.matmul %12, %11, %cst {dimension_numbers = #tpu.dot_dimension_numbers<[1], [0], [0], [1], [0, 0, 1, 1], [], []>} : vector<2x32xf32>, vector<32x128xf32>, vector<2x128xf32> -> vector<2x128xf32>
    %18 = arith.addf %16, %17 : vector<2x128xf32>
    %19 = vector.extract_strided_slice %18 {offsets = [0, 0], sizes = [2, 32], strides = [1, 1]} : vector<2x128xf32> to vector<2x32xf32>
    %20 = arith.negf %19 : vector<2x32xf32>
    %21 = math.exp %20 : vector<2x32xf32>
    %cst_17 = arith.constant 1.000000e+00 : f32
    %22 = vector.broadcast %cst_17 : f32 to vector<2x32xf32>
    %23 = arith.addf %22, %21 : vector<2x32xf32>
    %24 = arith.divf %22, %23 : vector<2x32xf32>
    %25 = vector.extract_strided_slice %18 {offsets = [0, 32], sizes = [2, 32], strides = [1, 1]} : vector<2x128xf32> to vector<2x32xf32>
    %26 = arith.negf %25 : vector<2x32xf32>
    %27 = math.exp %26 : vector<2x32xf32>
    %cst_18 = arith.constant 1.000000e+00 : f32
    %28 = vector.broadcast %cst_18 : f32 to vector<2x32xf32>
    %29 = arith.addf %28, %27 : vector<2x32xf32>
    %30 = arith.divf %28, %29 : vector<2x32xf32>
    %31 = vector.extract_strided_slice %18 {offsets = [0, 64], sizes = [2, 32], strides = [1, 1]} : vector<2x128xf32> to vector<2x32xf32>
    %32 = math.tanh %31 : vector<2x32xf32>
    %33 = vector.extract_strided_slice %18 {offsets = [0, 96], sizes = [2, 32], strides = [1, 1]} : vector<2x128xf32> to vector<2x32xf32>
    %34 = arith.negf %33 : vector<2x32xf32>
    %35 = math.exp %34 : vector<2x32xf32>
    %cst_19 = arith.constant 1.000000e+00 : f32
    %36 = vector.broadcast %cst_19 : f32 to vector<2x32xf32>
    %37 = arith.addf %36, %35 : vector<2x32xf32>
    %38 = arith.divf %36, %37 : vector<2x32xf32>
    %39 = arith.mulf %30, %13 : vector<2x32xf32>
    %40 = arith.mulf %24, %32 : vector<2x32xf32>
    %41 = arith.addf %39, %40 : vector<2x32xf32>
    %42 = math.tanh %41 : vector<2x32xf32>
    %43 = arith.mulf %38, %42 : vector<2x32xf32>
    %44 = arith.index_cast %c0_i32 : i32 to index
    %c0_20 = arith.constant 0 : index
    %c0_21 = arith.constant 0 : index
    %45 = vector.load %arg2[%44, %c0_20, %c0_21] : memref<8x2x1xf32, #tpu.memory_space<vmem>>, vector<1x2x1xf32>
    %46 = vector.shape_cast %45 : vector<1x2x1xf32> to vector<2x1xf32>
    %47 = arith.subf %43, %12 : vector<2x32xf32>
    %48 = vector.broadcast %46 : vector<2x1xf32> to vector<2x32xf32>
    %49 = arith.mulf %48, %47 : vector<2x32xf32>
    %50 = arith.addf %12, %49 : vector<2x32xf32>
    %51 = arith.subf %41, %13 : vector<2x32xf32>
    %52 = vector.broadcast %46 : vector<2x1xf32> to vector<2x32xf32>
    %53 = arith.mulf %52, %51 : vector<2x32xf32>
    %54 = arith.addf %13, %53 : vector<2x32xf32>
    %55 = vector.broadcast %46 : vector<2x1xf32> to vector<2x32xf32>
    %56 = arith.mulf %55, %43 : vector<2x32xf32>
    %cst_22 = arith.constant 1.000000e+00 : f32
    %57 = vector.broadcast %cst_22 : f32 to vector<2x1xf32>
    %58 = arith.subf %57, %46 : vector<2x1xf32>
    %cst_23 = arith.constant 0.000000e+00 : f32
    %59 = vector.broadcast %cst_23 : f32 to vector<2x1xf32>
    %60 = arith.mulf %58, %59 : vector<2x1xf32>
    %61 = vector.broadcast %60 : vector<2x1xf32> to vector<2x32xf32>
    %62 = arith.addf %56, %61 : vector<2x32xf32>
    %63 = arith.index_cast %c0_i32 : i32 to index
    %c0_24 = arith.constant 0 : index
    %c0_25 = arith.constant 0 : index
    %64 = vector.load %arg11[%63, %c0_24, %c0_25] : memref<8x2x32xf32, #tpu.memory_space<vmem>>, vector<1x2x32xf32>
    %65 = vector.shape_cast %64 : vector<1x2x32xf32> to vector<2x32xf32>
    %66 = vector.shape_cast %62 : vector<2x32xf32> to vector<1x2x32xf32>
    tpu.vector_store %arg11[%63, %c0_24, %c0_25], %66 {strides = array<i32>} : memref<8x2x32xf32, #tpu.memory_space<vmem>>, vector<1x2x32xf32>,
    %c1_i32 = arith.constant 1 : i32
    %67 = arith.index_cast %c1_i32 : i32 to index
    %c0_26 = arith.constant 0 : index
    %c0_27 = arith.constant 0 : index
    %68 = vector.load %arg14[%67, %c0_26, %c0_27] : memref<8x2x128xf32, #tpu.memory_space<vmem>>, vector<1x2x128xf32>
    %69 = vector.shape_cast %68 : vector<1x2x128xf32> to vector<2x128xf32>
    %cst_28 = arith.constant dense<0.000000e+00> : vector<2x128xf32>
    %70 = tpu.matmul %50, %11, %cst_28 {dimension_numbers = #tpu.dot_dimension_numbers<[1], [0], [0], [1], [0, 0, 1, 1], [], []>} : vector<2x32xf32>, vector<32x128xf32>, vector<2x128xf32> -> vector<2x128xf32>
    %71 = arith.addf %69, %70 : vector<2x128xf32>
    %72 = vector.extract_strided_slice %71 {offsets = [0, 0], sizes = [2, 32], strides = [1, 1]} : vector<2x128xf32> to vector<2x32xf32>
    %73 = arith.negf %72 : vector<2x32xf32>
    %74 = math.exp %73 : vector<2x32xf32>
    %cst_29 = arith.constant 1.000000e+00 : f32
    %75 = vector.broadcast %cst_29 : f32 to vector<2x32xf32>
    %76 = arith.addf %75, %74 : vector<2x32xf32>
    %77 = arith.divf %75, %76 : vector<2x32xf32>
    %78 = vector.extract_strided_slice %71 {offsets = [0, 32], sizes = [2, 32], strides = [1, 1]} : vector<2x128xf32> to vector<2x32xf32>
    %79 = arith.negf %78 : vector<2x32xf32>
    %80 = math.exp %79 : vector<2x32xf32>
    %cst_30 = arith.constant 1.000000e+00 : f32
    %81 = vector.broadcast %cst_30 : f32 to vector<2x32xf32>
    %82 = arith.addf %81, %80 : vector<2x32xf32>
    %83 = arith.divf %81, %82 : vector<2x32xf32>
    %84 = vector.extract_strided_slice %71 {offsets = [0, 64], sizes = [2, 32], strides = [1, 1]} : vector<2x128xf32> to vector<2x32xf32>
    %85 = math.tanh %84 : vector<2x32xf32>
    %86 = vector.extract_strided_slice %71 {offsets = [0, 96], sizes = [2, 32], strides = [1, 1]} : vector<2x128xf32> to vector<2x32xf32>
    %87 = arith.negf %86 : vector<2x32xf32>
    %88 = math.exp %87 : vector<2x32xf32>
    %cst_31 = arith.constant 1.000000e+00 : f32
    %89 = vector.broadcast %cst_31 : f32 to vector<2x32xf32>
    %90 = arith.addf %89, %88 : vector<2x32xf32>
    %91 = arith.divf %89, %90 : vector<2x32xf32>
    %92 = arith.mulf %83, %54 : vector<2x32xf32>
    %93 = arith.mulf %77, %85 : vector<2x32xf32>
    %94 = arith.addf %92, %93 : vector<2x32xf32>
    %95 = math.tanh %94 : vector<2x32xf32>
    %96 = arith.mulf %91, %95 : vector<2x32xf32>
    %97 = arith.index_cast %c1_i32 : i32 to index
    %c0_32 = arith.constant 0 : index
    %c0_33 = arith.constant 0 : index
    %98 = vector.load %arg2[%97, %c0_32, %c0_33] : memref<8x2x1xf32, #tpu.memory_space<vmem>>, vector<1x2x1xf32>
    %99 = vector.shape_cast %98 : vector<1x2x1xf32> to vector<2x1xf32>
    %100 = arith.subf %96, %50 : vector<2x32xf32>
    %101 = vector.broadcast %99 : vector<2x1xf32> to vector<2x32xf32>
    %102 = arith.mulf %101, %100 : vector<2x32xf32>
    %103 = arith.addf %50, %102 : vector<2x32xf32>
    %104 = arith.subf %94, %54 : vector<2x32xf32>
    %105 = vector.broadcast %99 : vector<2x1xf32> to vector<2x32xf32>
    %106 = arith.mulf %105, %104 : vector<2x32xf32>
    %107 = arith.addf %54, %106 : vector<2x32xf32>
    %108 = vector.broadcast %99 : vector<2x1xf32> to vector<2x32xf32>
    %109 = arith.mulf %108, %96 : vector<2x32xf32>
    %cst_34 = arith.constant 1.000000e+00 : f32
    %110 = vector.broadcast %cst_34 : f32 to vector<2x1xf32>
    %111 = arith.subf %110, %99 : vector<2x1xf32>
    %cst_35 = arith.constant 0.000000e+00 : f32
    %112 = vector.broadcast %cst_35 : f32 to vector<2x1xf32>
    %113 = arith.mulf %111, %112 : vector<2x1xf32>
    %114 = vector.broadcast %113 : vector<2x1xf32> to vector<2x32xf32>
    %115 = arith.addf %109, %114 : vector<2x32xf32>
    %116 = arith.index_cast %c1_i32 : i32 to index
    %c0_36 = arith.constant 0 : index
    %c0_37 = arith.constant 0 : index
    %117 = vector.load %arg11[%116, %c0_36, %c0_37] : memref<8x2x32xf32, #tpu.memory_space<vmem>>, vector<1x2x32xf32>
    %118 = vector.shape_cast %117 : vector<1x2x32xf32> to vector<2x32xf32>
    %119 = vector.shape_cast %115 : vector<2x32xf32> to vector<1x2x32xf32>
    tpu.vector_store %arg11[%116, %c0_36, %c0_37], %119 {strides = array<i32>} : memref<8x2x32xf32, #tpu.memory_space<vmem>>, vector<1x2x32xf32>,
    %c2_i32 = arith.constant 2 : i32
    %120 = arith.index_cast %c2_i32 : i32 to index
    %c0_38 = arith.constant 0 : index
    %c0_39 = arith.constant 0 : index
    %121 = vector.load %arg14[%120, %c0_38, %c0_39] : memref<8x2x128xf32, #tpu.memory_space<vmem>>, vector<1x2x128xf32>
    %122 = vector.shape_cast %121 : vector<1x2x128xf32> to vector<2x128xf32>
    %cst_40 = arith.constant dense<0.000000e+00> : vector<2x128xf32>
    %123 = tpu.matmul %103, %11, %cst_40 {dimension_numbers = #tpu.dot_dimension_numbers<[1], [0], [0], [1], [0, 0, 1, 1], [], []>} : vector<2x32xf32>, vector<32x128xf32>, vector<2x128xf32> -> vector<2x128xf32>
    %124 = arith.addf %122, %123 : vector<2x128xf32>
    %125 = vector.extract_strided_slice %124 {offsets = [0, 0], sizes = [2, 32], strides = [1, 1]} : vector<2x128xf32> to vector<2x32xf32>
    %126 = arith.negf %125 : vector<2x32xf32>
    %127 = math.exp %126 : vector<2x32xf32>
    %cst_41 = arith.constant 1.000000e+00 : f32
    %128 = vector.broadcast %cst_41 : f32 to vector<2x32xf32>
    %129 = arith.addf %128, %127 : vector<2x32xf32>
    %130 = arith.divf %128, %129 : vector<2x32xf32>
    %131 = vector.extract_strided_slice %124 {offsets = [0, 32], sizes = [2, 32], strides = [1, 1]} : vector<2x128xf32> to vector<2x32xf32>
    %132 = arith.negf %131 : vector<2x32xf32>
    %133 = math.exp %132 : vector<2x32xf32>
    %cst_42 = arith.constant 1.000000e+00 : f32
    %134 = vector.broadcast %cst_42 : f32 to vector<2x32xf32>
    %135 = arith.addf %134, %133 : vector<2x32xf32>
    %136 = arith.divf %134, %135 : vector<2x32xf32>
    %137 = vector.extract_strided_slice %124 {offsets = [0, 64], sizes = [2, 32], strides = [1, 1]} : vector<2x128xf32> to vector<2x32xf32>
    %138 = math.tanh %137 : vector<2x32xf32>
    %139 = vector.extract_strided_slice %124 {offsets = [0, 96], sizes = [2, 32], strides = [1, 1]} : vector<2x128xf32> to vector<2x32xf32>
    %140 = arith.negf %139 : vector<2x32xf32>
    %141 = math.exp %140 : vector<2x32xf32>
    %cst_43 = arith.constant 1.000000e+00 : f32
    %142 = vector.broadcast %cst_43 : f32 to vector<2x32xf32>
    %143 = arith.addf %142, %141 : vector<2x32xf32>
    %144 = arith.divf %142, %143 : vector<2x32xf32>
    %145 = arith.mulf %136, %107 : vector<2x32xf32>
    %146 = arith.mulf %130, %138 : vector<2x32xf32>
    %147 = arith.addf %145, %146 : vector<2x32xf32>
    %148 = math.tanh %147 : vector<2x32xf32>
    %149 = arith.mulf %144, %148 : vector<2x32xf32>
    %150 = arith.index_cast %c2_i32 : i32 to index
    %c0_44 = arith.constant 0 : index
    %c0_45 = arith.constant 0 : index
    %151 = vector.load %arg2[%150, %c0_44, %c0_45] : memref<8x2x1xf32, #tpu.memory_space<vmem>>, vector<1x2x1xf32>
    %152 = vector.shape_cast %151 : vector<1x2x1xf32> to vector<2x1xf32>
    %153 = arith.subf %149, %103 : vector<2x32xf32>
    %154 = vector.broadcast %152 : vector<2x1xf32> to vector<2x32xf32>
    %155 = arith.mulf %154, %153 : vector<2x32xf32>
    %156 = arith.addf %103, %155 : vector<2x32xf32>
    %157 = arith.subf %147, %107 : vector<2x32xf32>
    %158 = vector.broadcast %152 : vector<2x1xf32> to vector<2x32xf32>
    %159 = arith.mulf %158, %157 : vector<2x32xf32>
    %160 = arith.addf %107, %159 : vector<2x32xf32>
    %161 = vector.broadcast %152 : vector<2x1xf32> to vector<2x32xf32>
    %162 = arith.mulf %161, %149 : vector<2x32xf32>
    %cst_46 = arith.constant 1.000000e+00 : f32
    %163 = vector.broadcast %cst_46 : f32 to vector<2x1xf32>
    %164 = arith.subf %163, %152 : vector<2x1xf32>
    %cst_47 = arith.constant 0.000000e+00 : f32
    %165 = vector.broadcast %cst_47 : f32 to vector<2x1xf32>
    %166 = arith.mulf %164, %165 : vector<2x1xf32>
    %167 = vector.broadcast %166 : vector<2x1xf32> to vector<2x32xf32>
    %168 = arith.addf %162, %167 : vector<2x32xf32>
    %169 = arith.index_cast %c2_i32 : i32 to index
    %c0_48 = arith.constant 0 : index
    %c0_49 = arith.constant 0 : index
    %170 = vector.load %arg11[%169, %c0_48, %c0_49] : memref<8x2x32xf32, #tpu.memory_space<vmem>>, vector<1x2x32xf32>
    %171 = vector.shape_cast %170 : vector<1x2x32xf32> to vector<2x32xf32>
    %172 = vector.shape_cast %168 : vector<2x32xf32> to vector<1x2x32xf32>
    tpu.vector_store %arg11[%169, %c0_48, %c0_49], %172 {strides = array<i32>} : memref<8x2x32xf32, #tpu.memory_space<vmem>>, vector<1x2x32xf32>,
    %c3_i32 = arith.constant 3 : i32
    %173 = arith.index_cast %c3_i32 : i32 to index
    %c0_50 = arith.constant 0 : index
    %c0_51 = arith.constant 0 : index
    %174 = vector.load %arg14[%173, %c0_50, %c0_51] : memref<8x2x128xf32, #tpu.memory_space<vmem>>, vector<1x2x128xf32>
    %175 = vector.shape_cast %174 : vector<1x2x128xf32> to vector<2x128xf32>
    %cst_52 = arith.constant dense<0.000000e+00> : vector<2x128xf32>
    %176 = tpu.matmul %156, %11, %cst_52 {dimension_numbers = #tpu.dot_dimension_numbers<[1], [0], [0], [1], [0, 0, 1, 1], [], []>} : vector<2x32xf32>, vector<32x128xf32>, vector<2x128xf32> -> vector<2x128xf32>
    %177 = arith.addf %175, %176 : vector<2x128xf32>
    %178 = vector.extract_strided_slice %177 {offsets = [0, 0], sizes = [2, 32], strides = [1, 1]} : vector<2x128xf32> to vector<2x32xf32>
    %179 = arith.negf %178 : vector<2x32xf32>
    %180 = math.exp %179 : vector<2x32xf32>
    %cst_53 = arith.constant 1.000000e+00 : f32
    %181 = vector.broadcast %cst_53 : f32 to vector<2x32xf32>
    %182 = arith.addf %181, %180 : vector<2x32xf32>
    %183 = arith.divf %181, %182 : vector<2x32xf32>
    %184 = vector.extract_strided_slice %177 {offsets = [0, 32], sizes = [2, 32], strides = [1, 1]} : vector<2x128xf32> to vector<2x32xf32>
    %185 = arith.negf %184 : vector<2x32xf32>
    %186 = math.exp %185 : vector<2x32xf32>
    %cst_54 = arith.constant 1.000000e+00 : f32
    %187 = vector.broadcast %cst_54 : f32 to vector<2x32xf32>
    %188 = arith.addf %187, %186 : vector<2x32xf32>
    %189 = arith.divf %187, %188 : vector<2x32xf32>
    %190 = vector.extract_strided_slice %177 {offsets = [0, 64], sizes = [2, 32], strides = [1, 1]} : vector<2x128xf32> to vector<2x32xf32>
    %191 = math.tanh %190 : vector<2x32xf32>
    %192 = vector.extract_strided_slice %177 {offsets = [0, 96], sizes = [2, 32], strides = [1, 1]} : vector<2x128xf32> to vector<2x32xf32>
    %193 = arith.negf %192 : vector<2x32xf32>
    %194 = math.exp %193 : vector<2x32xf32>
    %cst_55 = arith.constant 1.000000e+00 : f32
    %195 = vector.broadcast %cst_55 : f32 to vector<2x32xf32>
    %196 = arith.addf %195, %194 : vector<2x32xf32>
    %197 = arith.divf %195, %196 : vector<2x32xf32>
    %198 = arith.mulf %189, %160 : vector<2x32xf32>
    %199 = arith.mulf %183, %191 : vector<2x32xf32>
    %200 = arith.addf %198, %199 : vector<2x32xf32>
    %201 = math.tanh %200 : vector<2x32xf32>
    %202 = arith.mulf %197, %201 : vector<2x32xf32>
    %203 = arith.index_cast %c3_i32 : i32 to index
    %c0_56 = arith.constant 0 : index
    %c0_57 = arith.constant 0 : index
    %204 = vector.load %arg2[%203, %c0_56, %c0_57] : memref<8x2x1xf32, #tpu.memory_space<vmem>>, vector<1x2x1xf32>
    %205 = vector.shape_cast %204 : vector<1x2x1xf32> to vector<2x1xf32>
    %206 = arith.subf %202, %156 : vector<2x32xf32>
    %207 = vector.broadcast %205 : vector<2x1xf32> to vector<2x32xf32>
    %208 = arith.mulf %207, %206 : vector<2x32xf32>
    %209 = arith.addf %156, %208 : vector<2x32xf32>
    %210 = arith.subf %200, %160 : vector<2x32xf32>
    %211 = vector.broadcast %205 : vector<2x1xf32> to vector<2x32xf32>
    %212 = arith.mulf %211, %210 : vector<2x32xf32>
    %213 = arith.addf %160, %212 : vector<2x32xf32>
    %214 = vector.broadcast %205 : vector<2x1xf32> to vector<2x32xf32>
    %215 = arith.mulf %214, %202 : vector<2x32xf32>
    %cst_58 = arith.constant 1.000000e+00 : f32
    %216 = vector.broadcast %cst_58 : f32 to vector<2x1xf32>
    %217 = arith.subf %216, %205 : vector<2x1xf32>
    %cst_59 = arith.constant 0.000000e+00 : f32
    %218 = vector.broadcast %cst_59 : f32 to vector<2x1xf32>
    %219 = arith.mulf %217, %218 : vector<2x1xf32>
    %220 = vector.broadcast %219 : vector<2x1xf32> to vector<2x32xf32>
    %221 = arith.addf %215, %220 : vector<2x32xf32>
    %222 = arith.index_cast %c3_i32 : i32 to index
    %c0_60 = arith.constant 0 : index
    %c0_61 = arith.constant 0 : index
    %223 = vector.load %arg11[%222, %c0_60, %c0_61] : memref<8x2x32xf32, #tpu.memory_space<vmem>>, vector<1x2x32xf32>
    %224 = vector.shape_cast %223 : vector<1x2x32xf32> to vector<2x32xf32>
    %225 = vector.shape_cast %221 : vector<2x32xf32> to vector<1x2x32xf32>
    tpu.vector_store %arg11[%222, %c0_60, %c0_61], %225 {strides = array<i32>} : memref<8x2x32xf32, #tpu.memory_space<vmem>>, vector<1x2x32xf32>,
    %c4_i32 = arith.constant 4 : i32
    %226 = arith.index_cast %c4_i32 : i32 to index
    %c0_62 = arith.constant 0 : index
    %c0_63 = arith.constant 0 : index
    %227 = vector.load %arg14[%226, %c0_62, %c0_63] : memref<8x2x128xf32, #tpu.memory_space<vmem>>, vector<1x2x128xf32>
    %228 = vector.shape_cast %227 : vector<1x2x128xf32> to vector<2x128xf32>
    %cst_64 = arith.constant dense<0.000000e+00> : vector<2x128xf32>
    %229 = tpu.matmul %209, %11, %cst_64 {dimension_numbers = #tpu.dot_dimension_numbers<[1], [0], [0], [1], [0, 0, 1, 1], [], []>} : vector<2x32xf32>, vector<32x128xf32>, vector<2x128xf32> -> vector<2x128xf32>
    %230 = arith.addf %228, %229 : vector<2x128xf32>
    %231 = vector.extract_strided_slice %230 {offsets = [0, 0], sizes = [2, 32], strides = [1, 1]} : vector<2x128xf32> to vector<2x32xf32>
    %232 = arith.negf %231 : vector<2x32xf32>
    %233 = math.exp %232 : vector<2x32xf32>
    %cst_65 = arith.constant 1.000000e+00 : f32
    %234 = vector.broadcast %cst_65 : f32 to vector<2x32xf32>
    %235 = arith.addf %234, %233 : vector<2x32xf32>
    %236 = arith.divf %234, %235 : vector<2x32xf32>
    %237 = vector.extract_strided_slice %230 {offsets = [0, 32], sizes = [2, 32], strides = [1, 1]} : vector<2x128xf32> to vector<2x32xf32>
    %238 = arith.negf %237 : vector<2x32xf32>
    %239 = math.exp %238 : vector<2x32xf32>
    %cst_66 = arith.constant 1.000000e+00 : f32
    %240 = vector.broadcast %cst_66 : f32 to vector<2x32xf32>
    %241 = arith.addf %240, %239 : vector<2x32xf32>
    %242 = arith.divf %240, %241 : vector<2x32xf32>
    %243 = vector.extract_strided_slice %230 {offsets = [0, 64], sizes = [2, 32], strides = [1, 1]} : vector<2x128xf32> to vector<2x32xf32>
    %244 = math.tanh %243 : vector<2x32xf32>
    %245 = vector.extract_strided_slice %230 {offsets = [0, 96], sizes = [2, 32], strides = [1, 1]} : vector<2x128xf32> to vector<2x32xf32>
    %246 = arith.negf %245 : vector<2x32xf32>
    %247 = math.exp %246 : vector<2x32xf32>
    %cst_67 = arith.constant 1.000000e+00 : f32
    %248 = vector.broadcast %cst_67 : f32 to vector<2x32xf32>
    %249 = arith.addf %248, %247 : vector<2x32xf32>
    %250 = arith.divf %248, %249 : vector<2x32xf32>
    %251 = arith.mulf %242, %213 : vector<2x32xf32>
    %252 = arith.mulf %236, %244 : vector<2x32xf32>
    %253 = arith.addf %251, %252 : vector<2x32xf32>
    %254 = math.tanh %253 : vector<2x32xf32>
    %255 = arith.mulf %250, %254 : vector<2x32xf32>
    %256 = arith.index_cast %c4_i32 : i32 to index
    %c0_68 = arith.constant 0 : index
    %c0_69 = arith.constant 0 : index
    %257 = vector.load %arg2[%256, %c0_68, %c0_69] : memref<8x2x1xf32, #tpu.memory_space<vmem>>, vector<1x2x1xf32>
    %258 = vector.shape_cast %257 : vector<1x2x1xf32> to vector<2x1xf32>
    %259 = arith.subf %255, %209 : vector<2x32xf32>
    %260 = vector.broadcast %258 : vector<2x1xf32> to vector<2x32xf32>
    %261 = arith.mulf %260, %259 : vector<2x32xf32>
    %262 = arith.addf %209, %261 : vector<2x32xf32>
    %263 = arith.subf %253, %213 : vector<2x32xf32>
    %264 = vector.broadcast %258 : vector<2x1xf32> to vector<2x32xf32>
    %265 = arith.mulf %264, %263 : vector<2x32xf32>
    %266 = arith.addf %213, %265 : vector<2x32xf32>
    %267 = vector.broadcast %258 : vector<2x1xf32> to vector<2x32xf32>
    %268 = arith.mulf %267, %255 : vector<2x32xf32>
    %cst_70 = arith.constant 1.000000e+00 : f32
    %269 = vector.broadcast %cst_70 : f32 to vector<2x1xf32>
    %270 = arith.subf %269, %258 : vector<2x1xf32>
    %cst_71 = arith.constant 0.000000e+00 : f32
    %271 = vector.broadcast %cst_71 : f32 to vector<2x1xf32>
    %272 = arith.mulf %270, %271 : vector<2x1xf32>
    %273 = vector.broadcast %272 : vector<2x1xf32> to vector<2x32xf32>
    %274 = arith.addf %268, %273 : vector<2x32xf32>
    %275 = arith.index_cast %c4_i32 : i32 to index
    %c0_72 = arith.constant 0 : index
    %c0_73 = arith.constant 0 : index
    %276 = vector.load %arg11[%275, %c0_72, %c0_73] : memref<8x2x32xf32, #tpu.memory_space<vmem>>, vector<1x2x32xf32>
    %277 = vector.shape_cast %276 : vector<1x2x32xf32> to vector<2x32xf32>
    %278 = vector.shape_cast %274 : vector<2x32xf32> to vector<1x2x32xf32>
    tpu.vector_store %arg11[%275, %c0_72, %c0_73], %278 {strides = array<i32>} : memref<8x2x32xf32, #tpu.memory_space<vmem>>, vector<1x2x32xf32>,
    %c5_i32 = arith.constant 5 : i32
    %279 = arith.index_cast %c5_i32 : i32 to index
    %c0_74 = arith.constant 0 : index
    %c0_75 = arith.constant 0 : index
    %280 = vector.load %arg14[%279, %c0_74, %c0_75] : memref<8x2x128xf32, #tpu.memory_space<vmem>>, vector<1x2x128xf32>
    %281 = vector.shape_cast %280 : vector<1x2x128xf32> to vector<2x128xf32>
    %cst_76 = arith.constant dense<0.000000e+00> : vector<2x128xf32>
    %282 = tpu.matmul %262, %11, %cst_76 {dimension_numbers = #tpu.dot_dimension_numbers<[1], [0], [0], [1], [0, 0, 1, 1], [], []>} : vector<2x32xf32>, vector<32x128xf32>, vector<2x128xf32> -> vector<2x128xf32>
    %283 = arith.addf %281, %282 : vector<2x128xf32>
    %284 = vector.extract_strided_slice %283 {offsets = [0, 0], sizes = [2, 32], strides = [1, 1]} : vector<2x128xf32> to vector<2x32xf32>
    %285 = arith.negf %284 : vector<2x32xf32>
    %286 = math.exp %285 : vector<2x32xf32>
    %cst_77 = arith.constant 1.000000e+00 : f32
    %287 = vector.broadcast %cst_77 : f32 to vector<2x32xf32>
    %288 = arith.addf %287, %286 : vector<2x32xf32>
    %289 = arith.divf %287, %288 : vector<2x32xf32>
    %290 = vector.extract_strided_slice %283 {offsets = [0, 32], sizes = [2, 32], strides = [1, 1]} : vector<2x128xf32> to vector<2x32xf32>
    %291 = arith.negf %290 : vector<2x32xf32>
    %292 = math.exp %291 : vector<2x32xf32>
    %cst_78 = arith.constant 1.000000e+00 : f32
    %293 = vector.broadcast %cst_78 : f32 to vector<2x32xf32>
    %294 = arith.addf %293, %292 : vector<2x32xf32>
    %295 = arith.divf %293, %294 : vector<2x32xf32>
    %296 = vector.extract_strided_slice %283 {offsets = [0, 64], sizes = [2, 32], strides = [1, 1]} : vector<2x128xf32> to vector<2x32xf32>
    %297 = math.tanh %296 : vector<2x32xf32>
    %298 = vector.extract_strided_slice %283 {offsets = [0, 96], sizes = [2, 32], strides = [1, 1]} : vector<2x128xf32> to vector<2x32xf32>
    %299 = arith.negf %298 : vector<2x32xf32>
    %300 = math.exp %299 : vector<2x32xf32>
    %cst_79 = arith.constant 1.000000e+00 : f32
    %301 = vector.broadcast %cst_79 : f32 to vector<2x32xf32>
    %302 = arith.addf %301, %300 : vector<2x32xf32>
    %303 = arith.divf %301, %302 : vector<2x32xf32>
    %304 = arith.mulf %295, %266 : vector<2x32xf32>
    %305 = arith.mulf %289, %297 : vector<2x32xf32>
    %306 = arith.addf %304, %305 : vector<2x32xf32>
    %307 = math.tanh %306 : vector<2x32xf32>
    %308 = arith.mulf %303, %307 : vector<2x32xf32>
    %309 = arith.index_cast %c5_i32 : i32 to index
    %c0_80 = arith.constant 0 : index
    %c0_81 = arith.constant 0 : index
    %310 = vector.load %arg2[%309, %c0_80, %c0_81] : memref<8x2x1xf32, #tpu.memory_space<vmem>>, vector<1x2x1xf32>
    %311 = vector.shape_cast %310 : vector<1x2x1xf32> to vector<2x1xf32>
    %312 = arith.subf %308, %262 : vector<2x32xf32>
    %313 = vector.broadcast %311 : vector<2x1xf32> to vector<2x32xf32>
    %314 = arith.mulf %313, %312 : vector<2x32xf32>
    %315 = arith.addf %262, %314 : vector<2x32xf32>
    %316 = arith.subf %306, %266 : vector<2x32xf32>
    %317 = vector.broadcast %311 : vector<2x1xf32> to vector<2x32xf32>
    %318 = arith.mulf %317, %316 : vector<2x32xf32>
    %319 = arith.addf %266, %318 : vector<2x32xf32>
    %320 = vector.broadcast %311 : vector<2x1xf32> to vector<2x32xf32>
    %321 = arith.mulf %320, %308 : vector<2x32xf32>
    %cst_82 = arith.constant 1.000000e+00 : f32
    %322 = vector.broadcast %cst_82 : f32 to vector<2x1xf32>
    %323 = arith.subf %322, %311 : vector<2x1xf32>
    %cst_83 = arith.constant 0.000000e+00 : f32
    %324 = vector.broadcast %cst_83 : f32 to vector<2x1xf32>
    %325 = arith.mulf %323, %324 : vector<2x1xf32>
    %326 = vector.broadcast %325 : vector<2x1xf32> to vector<2x32xf32>
    %327 = arith.addf %321, %326 : vector<2x32xf32>
    %328 = arith.index_cast %c5_i32 : i32 to index
    %c0_84 = arith.constant 0 : index
    %c0_85 = arith.constant 0 : index
    %329 = vector.load %arg11[%328, %c0_84, %c0_85] : memref<8x2x32xf32, #tpu.memory_space<vmem>>, vector<1x2x32xf32>
    %330 = vector.shape_cast %329 : vector<1x2x32xf32> to vector<2x32xf32>
    %331 = vector.shape_cast %327 : vector<2x32xf32> to vector<1x2x32xf32>
    tpu.vector_store %arg11[%328, %c0_84, %c0_85], %331 {strides = array<i32>} : memref<8x2x32xf32, #tpu.memory_space<vmem>>, vector<1x2x32xf32>,
    %c6_i32 = arith.constant 6 : i32
    %332 = arith.index_cast %c6_i32 : i32 to index
    %c0_86 = arith.constant 0 : index
    %c0_87 = arith.constant 0 : index
    %333 = vector.load %arg14[%332, %c0_86, %c0_87] : memref<8x2x128xf32, #tpu.memory_space<vmem>>, vector<1x2x128xf32>
    %334 = vector.shape_cast %333 : vector<1x2x128xf32> to vector<2x128xf32>
    %cst_88 = arith.constant dense<0.000000e+00> : vector<2x128xf32>
    %335 = tpu.matmul %315, %11, %cst_88 {dimension_numbers = #tpu.dot_dimension_numbers<[1], [0], [0], [1], [0, 0, 1, 1], [], []>} : vector<2x32xf32>, vector<32x128xf32>, vector<2x128xf32> -> vector<2x128xf32>
    %336 = arith.addf %334, %335 : vector<2x128xf32>
    %337 = vector.extract_strided_slice %336 {offsets = [0, 0], sizes = [2, 32], strides = [1, 1]} : vector<2x128xf32> to vector<2x32xf32>
    %338 = arith.negf %337 : vector<2x32xf32>
    %339 = math.exp %338 : vector<2x32xf32>
    %cst_89 = arith.constant 1.000000e+00 : f32
    %340 = vector.broadcast %cst_89 : f32 to vector<2x32xf32>
    %341 = arith.addf %340, %339 : vector<2x32xf32>
    %342 = arith.divf %340, %341 : vector<2x32xf32>
    %343 = vector.extract_strided_slice %336 {offsets = [0, 32], sizes = [2, 32], strides = [1, 1]} : vector<2x128xf32> to vector<2x32xf32>
    %344 = arith.negf %343 : vector<2x32xf32>
    %345 = math.exp %344 : vector<2x32xf32>
    %cst_90 = arith.constant 1.000000e+00 : f32
    %346 = vector.broadcast %cst_90 : f32 to vector<2x32xf32>
    %347 = arith.addf %346, %345 : vector<2x32xf32>
    %348 = arith.divf %346, %347 : vector<2x32xf32>
    %349 = vector.extract_strided_slice %336 {offsets = [0, 64], sizes = [2, 32], strides = [1, 1]} : vector<2x128xf32> to vector<2x32xf32>
    %350 = math.tanh %349 : vector<2x32xf32>
    %351 = vector.extract_strided_slice %336 {offsets = [0, 96], sizes = [2, 32], strides = [1, 1]} : vector<2x128xf32> to vector<2x32xf32>
    %352 = arith.negf %351 : vector<2x32xf32>
    %353 = math.exp %352 : vector<2x32xf32>
    %cst_91 = arith.constant 1.000000e+00 : f32
    %354 = vector.broadcast %cst_91 : f32 to vector<2x32xf32>
    %355 = arith.addf %354, %353 : vector<2x32xf32>
    %356 = arith.divf %354, %355 : vector<2x32xf32>
    %357 = arith.mulf %348, %319 : vector<2x32xf32>
    %358 = arith.mulf %342, %350 : vector<2x32xf32>
    %359 = arith.addf %357, %358 : vector<2x32xf32>
    %360 = math.tanh %359 : vector<2x32xf32>
    %361 = arith.mulf %356, %360 : vector<2x32xf32>
    %362 = arith.index_cast %c6_i32 : i32 to index
    %c0_92 = arith.constant 0 : index
    %c0_93 = arith.constant 0 : index
    %363 = vector.load %arg2[%362, %c0_92, %c0_93] : memref<8x2x1xf32, #tpu.memory_space<vmem>>, vector<1x2x1xf32>
    %364 = vector.shape_cast %363 : vector<1x2x1xf32> to vector<2x1xf32>
    %365 = arith.subf %361, %315 : vector<2x32xf32>
    %366 = vector.broadcast %364 : vector<2x1xf32> to vector<2x32xf32>
    %367 = arith.mulf %366, %365 : vector<2x32xf32>
    %368 = arith.addf %315, %367 : vector<2x32xf32>
    %369 = arith.subf %359, %319 : vector<2x32xf32>
    %370 = vector.broadcast %364 : vector<2x1xf32> to vector<2x32xf32>
    %371 = arith.mulf %370, %369 : vector<2x32xf32>
    %372 = arith.addf %319, %371 : vector<2x32xf32>
    %373 = vector.broadcast %364 : vector<2x1xf32> to vector<2x32xf32>
    %374 = arith.mulf %373, %361 : vector<2x32xf32>
    %cst_94 = arith.constant 1.000000e+00 : f32
    %375 = vector.broadcast %cst_94 : f32 to vector<2x1xf32>
    %376 = arith.subf %375, %364 : vector<2x1xf32>
    %cst_95 = arith.constant 0.000000e+00 : f32
    %377 = vector.broadcast %cst_95 : f32 to vector<2x1xf32>
    %378 = arith.mulf %376, %377 : vector<2x1xf32>
    %379 = vector.broadcast %378 : vector<2x1xf32> to vector<2x32xf32>
    %380 = arith.addf %374, %379 : vector<2x32xf32>
    %381 = arith.index_cast %c6_i32 : i32 to index
    %c0_96 = arith.constant 0 : index
    %c0_97 = arith.constant 0 : index
    %382 = vector.load %arg11[%381, %c0_96, %c0_97] : memref<8x2x32xf32, #tpu.memory_space<vmem>>, vector<1x2x32xf32>
    %383 = vector.shape_cast %382 : vector<1x2x32xf32> to vector<2x32xf32>
    %384 = vector.shape_cast %380 : vector<2x32xf32> to vector<1x2x32xf32>
    tpu.vector_store %arg11[%381, %c0_96, %c0_97], %384 {strides = array<i32>} : memref<8x2x32xf32, #tpu.memory_space<vmem>>, vector<1x2x32xf32>,
    %c7_i32 = arith.constant 7 : i32
    %385 = arith.index_cast %c7_i32 : i32 to index
    %c0_98 = arith.constant 0 : index
    %c0_99 = arith.constant 0 : index
    %386 = vector.load %arg14[%385, %c0_98, %c0_99] : memref<8x2x128xf32, #tpu.memory_space<vmem>>, vector<1x2x128xf32>
    %387 = vector.shape_cast %386 : vector<1x2x128xf32> to vector<2x128xf32>
    %cst_100 = arith.constant dense<0.000000e+00> : vector<2x128xf32>
    %388 = tpu.matmul %368, %11, %cst_100 {dimension_numbers = #tpu.dot_dimension_numbers<[1], [0], [0], [1], [0, 0, 1, 1], [], []>} : vector<2x32xf32>, vector<32x128xf32>, vector<2x128xf32> -> vector<2x128xf32>
    %389 = arith.addf %387, %388 : vector<2x128xf32>
    %390 = vector.extract_strided_slice %389 {offsets = [0, 0], sizes = [2, 32], strides = [1, 1]} : vector<2x128xf32> to vector<2x32xf32>
    %391 = arith.negf %390 : vector<2x32xf32>
    %392 = math.exp %391 : vector<2x32xf32>
    %cst_101 = arith.constant 1.000000e+00 : f32
    %393 = vector.broadcast %cst_101 : f32 to vector<2x32xf32>
    %394 = arith.addf %393, %392 : vector<2x32xf32>
    %395 = arith.divf %393, %394 : vector<2x32xf32>
    %396 = vector.extract_strided_slice %389 {offsets = [0, 32], sizes = [2, 32], strides = [1, 1]} : vector<2x128xf32> to vector<2x32xf32>
    %397 = arith.negf %396 : vector<2x32xf32>
    %398 = math.exp %397 : vector<2x32xf32>
    %cst_102 = arith.constant 1.000000e+00 : f32
    %399 = vector.broadcast %cst_102 : f32 to vector<2x32xf32>
    %400 = arith.addf %399, %398 : vector<2x32xf32>
    %401 = arith.divf %399, %400 : vector<2x32xf32>
    %402 = vector.extract_strided_slice %389 {offsets = [0, 64], sizes = [2, 32], strides = [1, 1]} : vector<2x128xf32> to vector<2x32xf32>
    %403 = math.tanh %402 : vector<2x32xf32>
    %404 = vector.extract_strided_slice %389 {offsets = [0, 96], sizes = [2, 32], strides = [1, 1]} : vector<2x128xf32> to vector<2x32xf32>
    %405 = arith.negf %404 : vector<2x32xf32>
    %406 = math.exp %405 : vector<2x32xf32>
    %cst_103 = arith.constant 1.000000e+00 : f32
    %407 = vector.broadcast %cst_103 : f32 to vector<2x32xf32>
    %408 = arith.addf %407, %406 : vector<2x32xf32>
    %409 = arith.divf %407, %408 : vector<2x32xf32>
    %410 = arith.mulf %401, %372 : vector<2x32xf32>
    %411 = arith.mulf %395, %403 : vector<2x32xf32>
    %412 = arith.addf %410, %411 : vector<2x32xf32>
    %413 = math.tanh %412 : vector<2x32xf32>
    %414 = arith.mulf %409, %413 : vector<2x32xf32>
    %415 = arith.index_cast %c7_i32 : i32 to index
    %c0_104 = arith.constant 0 : index
    %c0_105 = arith.constant 0 : index
    %416 = vector.load %arg2[%415, %c0_104, %c0_105] : memref<8x2x1xf32, #tpu.memory_space<vmem>>, vector<1x2x1xf32>
    %417 = vector.shape_cast %416 : vector<1x2x1xf32> to vector<2x1xf32>
    %418 = arith.subf %414, %368 : vector<2x32xf32>
    %419 = vector.broadcast %417 : vector<2x1xf32> to vector<2x32xf32>
    %420 = arith.mulf %419, %418 : vector<2x32xf32>
    %421 = arith.addf %368, %420 : vector<2x32xf32>
    %422 = arith.subf %412, %372 : vector<2x32xf32>
    %423 = vector.broadcast %417 : vector<2x1xf32> to vector<2x32xf32>
    %424 = arith.mulf %423, %422 : vector<2x32xf32>
    %425 = arith.addf %372, %424 : vector<2x32xf32>
    %426 = vector.broadcast %417 : vector<2x1xf32> to vector<2x32xf32>
    %427 = arith.mulf %426, %414 : vector<2x32xf32>
    %cst_106 = arith.constant 1.000000e+00 : f32
    %428 = vector.broadcast %cst_106 : f32 to vector<2x1xf32>
    %429 = arith.subf %428, %417 : vector<2x1xf32>
    %cst_107 = arith.constant 0.000000e+00 : f32
    %430 = vector.broadcast %cst_107 : f32 to vector<2x1xf32>
    %431 = arith.mulf %429, %430 : vector<2x1xf32>
    %432 = vector.broadcast %431 : vector<2x1xf32> to vector<2x32xf32>
    %433 = arith.addf %427, %432 : vector<2x32xf32>
    %434 = arith.index_cast %c7_i32 : i32 to index
    %c0_108 = arith.constant 0 : index
    %c0_109 = arith.constant 0 : index
    %435 = vector.load %arg11[%434, %c0_108, %c0_109] : memref<8x2x32xf32, #tpu.memory_space<vmem>>, vector<1x2x32xf32>
    %436 = vector.shape_cast %435 : vector<1x2x32xf32> to vector<2x32xf32>
    %437 = vector.shape_cast %433 : vector<2x32xf32> to vector<1x2x32xf32>
    tpu.vector_store %arg11[%434, %c0_108, %c0_109], %437 {strides = array<i32>} : memref<8x2x32xf32, #tpu.memory_space<vmem>>, vector<1x2x32xf32>,
    %c8_i32 = arith.constant 8 : i32
    %c0_110 = arith.constant 0 : index
    %c0_111 = arith.constant 0 : index
    %438 = vector.load %arg12[%c0_110, %c0_111] : memref<2x32xf32, #tpu.memory_space<vmem>>, vector<2x32xf32>
    tpu.vector_store %arg12[%c0_110, %c0_111], %421 {strides = array<i32>} : memref<2x32xf32, #tpu.memory_space<vmem>>, vector<2x32xf32>,
    %c0_112 = arith.constant 0 : index
    %c0_113 = arith.constant 0 : index
    %439 = vector.load %arg13[%c0_112, %c0_113] : memref<2x32xf32, #tpu.memory_space<vmem>>, vector<2x32xf32>
    tpu.vector_store %arg13[%c0_112, %c0_113], %425 {strides = array<i32>} : memref<2x32xf32, #tpu.memory_space<vmem>>, vector<2x32xf32>,
    %c0_114 = arith.constant 0 : index
    %c0_115 = arith.constant 0 : index
    %440 = vector.load %arg8[%c0_114, %c0_115] : memref<32x128xf32, #tpu.memory_space<vmem>>, vector<32x128xf32>
    %c0_116 = arith.constant 0 : index
    %c0_117 = arith.constant 0 : index
    %441 = vector.load %arg9[%c0_116, %c0_117] : memref<1x128xf32, #tpu.memory_space<vmem>>, vector<1x128xf32>
    %c0_118 = arith.constant 0 : index
    %c0_119 = arith.constant 0 : index
    %c0_120 = arith.constant 0 : index
    %442 = vector.load %arg11[%c0_118, %c0_119, %c0_120] : memref<8x2x32xf32, #tpu.memory_space<vmem>>, vector<1x2x32xf32>
    %443 = vector.shape_cast %442 : vector<1x2x32xf32> to vector<2x32xf32>
    %cst_121 = arith.constant dense<0.000000e+00> : vector<2x128xf32>
    %444 = tpu.matmul %443, %440, %cst_121 {dimension_numbers = #tpu.dot_dimension_numbers<[1], [0], [0], [1], [0, 0, 1, 1], [], []>} : vector<2x32xf32>, vector<32x128xf32>, vector<2x128xf32> -> vector<2x128xf32>
    %445 = vector.broadcast %441 : vector<1x128xf32> to vector<2x128xf32>
    %446 = arith.addf %444, %445 : vector<2x128xf32>
    %c0_122 = arith.constant 0 : index
    %c0_123 = arith.constant 0 : index
    %c0_124 = arith.constant 0 : index
    %447 = vector.load %arg10[%c0_122, %c0_123, %c0_124] : memref<8x2x128xf32, #tpu.memory_space<vmem>>, vector<1x2x128xf32>
    %448 = vector.shape_cast %447 : vector<1x2x128xf32> to vector<2x128xf32>
    %449 = vector.shape_cast %446 : vector<2x128xf32> to vector<1x2x128xf32>
    tpu.vector_store %arg10[%c0_122, %c0_123, %c0_124], %449 {strides = array<i32>} : memref<8x2x128xf32, #tpu.memory_space<vmem>>, vector<1x2x128xf32>,
    %c1 = arith.constant 1 : index
    %c0_125 = arith.constant 0 : index
    %c0_126 = arith.constant 0 : index
    %450 = vector.load %arg11[%c1, %c0_125, %c0_126] : memref<8x2x32xf32, #tpu.memory_space<vmem>>, vector<1x2x32xf32>
    %451 = vector.shape_cast %450 : vector<1x2x32xf32> to vector<2x32xf32>
    %cst_127 = arith.constant dense<0.000000e+00> : vector<2x128xf32>
    %452 = tpu.matmul %451, %440, %cst_127 {dimension_numbers = #tpu.dot_dimension_numbers<[1], [0], [0], [1], [0, 0, 1, 1], [], []>} : vector<2x32xf32>, vector<32x128xf32>, vector<2x128xf32> -> vector<2x128xf32>
    %453 = vector.broadcast %441 : vector<1x128xf32> to vector<2x128xf32>
    %454 = arith.addf %452, %453 : vector<2x128xf32>
    %c1_128 = arith.constant 1 : index
    %c0_129 = arith.constant 0 : index
    %c0_130 = arith.constant 0 : index
    %455 = vector.load %arg10[%c1_128, %c0_129, %c0_130] : memref<8x2x128xf32, #tpu.memory_space<vmem>>, vector<1x2x128xf32>
    %456 = vector.shape_cast %455 : vector<1x2x128xf32> to vector<2x128xf32>
    %457 = vector.shape_cast %454 : vector<2x128xf32> to vector<1x2x128xf32>
    tpu.vector_store %arg10[%c1_128, %c0_129, %c0_130], %457 {strides = array<i32>} : memref<8x2x128xf32, #tpu.memory_space<vmem>>, vector<1x2x128xf32>,
    %c2 = arith.constant 2 : index
    %c0_131 = arith.constant 0 : index
    %c0_132 = arith.constant 0 : index
    %458 = vector.load %arg11[%c2, %c0_131, %c0_132] : memref<8x2x32xf32, #tpu.memory_space<vmem>>, vector<1x2x32xf32>
    %459 = vector.shape_cast %458 : vector<1x2x32xf32> to vector<2x32xf32>
    %cst_133 = arith.constant dense<0.000000e+00> : vector<2x128xf32>
    %460 = tpu.matmul %459, %440, %cst_133 {dimension_numbers = #tpu.dot_dimension_numbers<[1], [0], [0], [1], [0, 0, 1, 1], [], []>} : vector<2x32xf32>, vector<32x128xf32>, vector<2x128xf32> -> vector<2x128xf32>
    %461 = vector.broadcast %441 : vector<1x128xf32> to vector<2x128xf32>
    %462 = arith.addf %460, %461 : vector<2x128xf32>
    %c2_134 = arith.constant 2 : index
    %c0_135 = arith.constant 0 : index
    %c0_136 = arith.constant 0 : index
    %463 = vector.load %arg10[%c2_134, %c0_135, %c0_136] : memref<8x2x128xf32, #tpu.memory_space<vmem>>, vector<1x2x128xf32>
    %464 = vector.shape_cast %463 : vector<1x2x128xf32> to vector<2x128xf32>
    %465 = vector.shape_cast %462 : vector<2x128xf32> to vector<1x2x128xf32>
    tpu.vector_store %arg10[%c2_134, %c0_135, %c0_136], %465 {strides = array<i32>} : memref<8x2x128xf32, #tpu.memory_space<vmem>>, vector<1x2x128xf32>,
    %c3 = arith.constant 3 : index
    %c0_137 = arith.constant 0 : index
    %c0_138 = arith.constant 0 : index
    %466 = vector.load %arg11[%c3, %c0_137, %c0_138] : memref<8x2x32xf32, #tpu.memory_space<vmem>>, vector<1x2x32xf32>
    %467 = vector.shape_cast %466 : vector<1x2x32xf32> to vector<2x32xf32>
    %cst_139 = arith.constant dense<0.000000e+00> : vector<2x128xf32>
    %468 = tpu.matmul %467, %440, %cst_139 {dimension_numbers = #tpu.dot_dimension_numbers<[1], [0], [0], [1], [0, 0, 1, 1], [], []>} : vector<2x32xf32>, vector<32x128xf32>, vector<2x128xf32> -> vector<2x128xf32>
    %469 = vector.broadcast %441 : vector<1x128xf32> to vector<2x128xf32>
    %470 = arith.addf %468, %469 : vector<2x128xf32>
    %c3_140 = arith.constant 3 : index
    %c0_141 = arith.constant 0 : index
    %c0_142 = arith.constant 0 : index
    %471 = vector.load %arg10[%c3_140, %c0_141, %c0_142] : memref<8x2x128xf32, #tpu.memory_space<vmem>>, vector<1x2x128xf32>
    %472 = vector.shape_cast %471 : vector<1x2x128xf32> to vector<2x128xf32>
    %473 = vector.shape_cast %470 : vector<2x128xf32> to vector<1x2x128xf32>
    tpu.vector_store %arg10[%c3_140, %c0_141, %c0_142], %473 {strides = array<i32>} : memref<8x2x128xf32, #tpu.memory_space<vmem>>, vector<1x2x128xf32>,
    %c4 = arith.constant 4 : index
    %c0_143 = arith.constant 0 : index
    %c0_144 = arith.constant 0 : index
    %474 = vector.load %arg11[%c4, %c0_143, %c0_144] : memref<8x2x32xf32, #tpu.memory_space<vmem>>, vector<1x2x32xf32>
    %475 = vector.shape_cast %474 : vector<1x2x32xf32> to vector<2x32xf32>
    %cst_145 = arith.constant dense<0.000000e+00> : vector<2x128xf32>
    %476 = tpu.matmul %475, %440, %cst_145 {dimension_numbers = #tpu.dot_dimension_numbers<[1], [0], [0], [1], [0, 0, 1, 1], [], []>} : vector<2x32xf32>, vector<32x128xf32>, vector<2x128xf32> -> vector<2x128xf32>
    %477 = vector.broadcast %441 : vector<1x128xf32> to vector<2x128xf32>
    %478 = arith.addf %476, %477 : vector<2x128xf32>
    %c4_146 = arith.constant 4 : index
    %c0_147 = arith.constant 0 : index
    %c0_148 = arith.constant 0 : index
    %479 = vector.load %arg10[%c4_146, %c0_147, %c0_148] : memref<8x2x128xf32, #tpu.memory_space<vmem>>, vector<1x2x128xf32>
    %480 = vector.shape_cast %479 : vector<1x2x128xf32> to vector<2x128xf32>
    %481 = vector.shape_cast %478 : vector<2x128xf32> to vector<1x2x128xf32>
    tpu.vector_store %arg10[%c4_146, %c0_147, %c0_148], %481 {strides = array<i32>} : memref<8x2x128xf32, #tpu.memory_space<vmem>>, vector<1x2x128xf32>,
    %c5 = arith.constant 5 : index
    %c0_149 = arith.constant 0 : index
    %c0_150 = arith.constant 0 : index
    %482 = vector.load %arg11[%c5, %c0_149, %c0_150] : memref<8x2x32xf32, #tpu.memory_space<vmem>>, vector<1x2x32xf32>
    %483 = vector.shape_cast %482 : vector<1x2x32xf32> to vector<2x32xf32>
    %cst_151 = arith.constant dense<0.000000e+00> : vector<2x128xf32>
    %484 = tpu.matmul %483, %440, %cst_151 {dimension_numbers = #tpu.dot_dimension_numbers<[1], [0], [0], [1], [0, 0, 1, 1], [], []>} : vector<2x32xf32>, vector<32x128xf32>, vector<2x128xf32> -> vector<2x128xf32>
    %485 = vector.broadcast %441 : vector<1x128xf32> to vector<2x128xf32>
    %486 = arith.addf %484, %485 : vector<2x128xf32>
    %c5_152 = arith.constant 5 : index
    %c0_153 = arith.constant 0 : index
    %c0_154 = arith.constant 0 : index
    %487 = vector.load %arg10[%c5_152, %c0_153, %c0_154] : memref<8x2x128xf32, #tpu.memory_space<vmem>>, vector<1x2x128xf32>
    %488 = vector.shape_cast %487 : vector<1x2x128xf32> to vector<2x128xf32>
    %489 = vector.shape_cast %486 : vector<2x128xf32> to vector<1x2x128xf32>
    tpu.vector_store %arg10[%c5_152, %c0_153, %c0_154], %489 {strides = array<i32>} : memref<8x2x128xf32, #tpu.memory_space<vmem>>, vector<1x2x128xf32>,
    %c6 = arith.constant 6 : index
    %c0_155 = arith.constant 0 : index
    %c0_156 = arith.constant 0 : index
    %490 = vector.load %arg11[%c6, %c0_155, %c0_156] : memref<8x2x32xf32, #tpu.memory_space<vmem>>, vector<1x2x32xf32>
    %491 = vector.shape_cast %490 : vector<1x2x32xf32> to vector<2x32xf32>
    %cst_157 = arith.constant dense<0.000000e+00> : vector<2x128xf32>
    %492 = tpu.matmul %491, %440, %cst_157 {dimension_numbers = #tpu.dot_dimension_numbers<[1], [0], [0], [1], [0, 0, 1, 1], [], []>} : vector<2x32xf32>, vector<32x128xf32>, vector<2x128xf32> -> vector<2x128xf32>
    %493 = vector.broadcast %441 : vector<1x128xf32> to vector<2x128xf32>
    %494 = arith.addf %492, %493 : vector<2x128xf32>
    %c6_158 = arith.constant 6 : index
    %c0_159 = arith.constant 0 : index
    %c0_160 = arith.constant 0 : index
    %495 = vector.load %arg10[%c6_158, %c0_159, %c0_160] : memref<8x2x128xf32, #tpu.memory_space<vmem>>, vector<1x2x128xf32>
    %496 = vector.shape_cast %495 : vector<1x2x128xf32> to vector<2x128xf32>
    %497 = vector.shape_cast %494 : vector<2x128xf32> to vector<1x2x128xf32>
    tpu.vector_store %arg10[%c6_158, %c0_159, %c0_160], %497 {strides = array<i32>} : memref<8x2x128xf32, #tpu.memory_space<vmem>>, vector<1x2x128xf32>,
    %c7 = arith.constant 7 : index
    %c0_161 = arith.constant 0 : index
    %c0_162 = arith.constant 0 : index
    %498 = vector.load %arg11[%c7, %c0_161, %c0_162] : memref<8x2x32xf32, #tpu.memory_space<vmem>>, vector<1x2x32xf32>
    %499 = vector.shape_cast %498 : vector<1x2x32xf32> to vector<2x32xf32>
    %cst_163 = arith.constant dense<0.000000e+00> : vector<2x128xf32>
    %500 = tpu.matmul %499, %440, %cst_163 {dimension_numbers = #tpu.dot_dimension_numbers<[1], [0], [0], [1], [0, 0, 1, 1], [], []>} : vector<2x32xf32>, vector<32x128xf32>, vector<2x128xf32> -> vector<2x128xf32>
    %501 = vector.broadcast %441 : vector<1x128xf32> to vector<2x128xf32>
    %502 = arith.addf %500, %501 : vector<2x128xf32>
    %c7_164 = arith.constant 7 : index
    %c0_165 = arith.constant 0 : index
    %c0_166 = arith.constant 0 : index
    %503 = vector.load %arg10[%c7_164, %c0_165, %c0_166] : memref<8x2x128xf32, #tpu.memory_space<vmem>>, vector<1x2x128xf32>
    %504 = vector.shape_cast %503 : vector<1x2x128xf32> to vector<2x128xf32>
    %505 = vector.shape_cast %502 : vector<2x128xf32> to vector<1x2x128xf32>
    tpu.vector_store %arg10[%c7_164, %c0_165, %c0_166], %505 {strides = array<i32>} : memref<8x2x128xf32, #tpu.memory_space<vmem>>, vector<1x2x128xf32>,
    return
  }
  func.func @transform_0(%arg0: i32) -> (i32, i32, i32) {
    %c0_i32 = arith.constant 0 : i32
    %c0_i32_0 = arith.constant 0 : i32
    %c0_i32_1 = arith.constant 0 : i32
    return %c0_i32, %arg0, %c0_i32_0 : i32, i32, i32
  }
  func.func @transform_1(%arg0: i32) -> (i32, i32, i32) {
    %c0_i32 = arith.constant 0 : i32
    %c0_i32_0 = arith.constant 0 : i32
    %c0_i32_1 = arith.constant 0 : i32
    return %c0_i32, %arg0, %c0_i32_0 : i32, i32, i32
  }
  func.func @transform_2(%arg0: i32) -> (i32, i32) {
    %c0_i32 = arith.constant 0 : i32
    %c0_i32_0 = arith.constant 0 : i32
    return %arg0, %c0_i32 : i32, i32
  }
  func.func @transform_3(%arg0: i32) -> (i32, i32) {
    %c0_i32 = arith.constant 0 : i32
    %c0_i32_0 = arith.constant 0 : i32
    return %arg0, %c0_i32 : i32, i32
  }
  func.func @transform_4(%arg0: i32) -> (i32, i32) {
    %c0_i32 = arith.constant 0 : i32
    %c0_i32_0 = arith.constant 0 : i32
    %c0_i32_1 = arith.constant 0 : i32
    return %c0_i32, %c0_i32_0 : i32, i32
  }
  func.func @transform_5(%arg0: i32) -> (i32, i32) {
    %c0_i32 = arith.constant 0 : i32
    %c0_i32_0 = arith.constant 0 : i32
    %c0_i32_1 = arith.constant 0 : i32
    return %c0_i32, %c0_i32_0 : i32, i32
  }
  func.func @transform_6(%arg0: i32) -> (i32, i32) {
    %c0_i32 = arith.constant 0 : i32
    %c0_i32_0 = arith.constant 0 : i32
    %c0_i32_1 = arith.constant 0 : i32
    return %c0_i32, %c0_i32_0 : i32, i32
  }
  func.func @transform_7(%arg0: i32) -> (i32, i32) {
    %c0_i32 = arith.constant 0 : i32
    %c0_i32_0 = arith.constant 0 : i32
    %c0_i32_1 = arith.constant 0 : i32
    return %c0_i32, %c0_i32_0 : i32, i32
  }
  func.func @transform_8(%arg0: i32) -> (i32, i32) {
    %c0_i32 = arith.constant 0 : i32
    %c0_i32_0 = arith.constant 0 : i32
    %c0_i32_1 = arith.constant 0 : i32
    return %c0_i32, %c0_i32_0 : i32, i32
  }
  func.func @transform_9(%arg0: i32) -> (i32, i32, i32) {
    %c0_i32 = arith.constant 0 : i32
    %c0_i32_0 = arith.constant 0 : i32
    %c0_i32_1 = arith.constant 0 : i32
    return %c0_i32, %arg0, %c0_i32_0 : i32, i32, i32
  }
  func.func @transform_10(%arg0: i32) -> (i32, i32, i32) {
    %c0_i32 = arith.constant 0 : i32
    %c0_i32_0 = arith.constant 0 : i32
    %c0_i32_1 = arith.constant 0 : i32
    return %c0_i32, %arg0, %c0_i32_0 : i32, i32, i32
  }
  func.func @transform_11(%arg0: i32) -> (i32, i32) {
    %c0_i32 = arith.constant 0 : i32
    %c0_i32_0 = arith.constant 0 : i32
    return %arg0, %c0_i32 : i32, i32
  }
  func.func @transform_12(%arg0: i32) -> (i32, i32) {
    %c0_i32 = arith.constant 0 : i32
    %c0_i32_0 = arith.constant 0 : i32
    return %arg0, %c0_i32 : i32, i32
  }
}

</mosaic_0001>

<bundles_post_ra>
// kernel: tpu_custom_call.1
= control target key start
LH: loop header
LB: loop body
LE: loop exit
PB: predicated region body
PF: predicated region fallthrough
CT: control target
= control target key end

     0   :  { %18 = vsyncpa [#allocation4], 0  ;;  %s3114_s0 = inlined_call_operand.vmem [shape: f32[8,2,1], index: 0, kind: input, shape index: {}]   ;;  %s3115_s1 = inlined_call_operand.vmem [shape: f32[8,2,1], index: 1, kind: input, shape index: {}]   ;;  %s3116_s2 = inlined_call_operand.vmem [shape: f32[2,32], index: 2, kind: input, shape index: {}]   ;;  %s3117_s3 = inlined_call_operand.vmem [shape: f32[2,32], index: 3, kind: input, shape index: {}]   ;;  %s3118_s4 = inlined_call_operand.vmem [shape: f32[1,128], index: 4, kind: input, shape index: {}]   ;;  %s3119_s5 = inlined_call_operand.vmem [shape: f32[32,128], index: 5, kind: input, shape index: {}]   ;;  %s3120_s6 = inlined_call_operand.vmem [shape: f32[1,128], index: 6, kind: input, shape index: {}]   ;;  %s3121_s7 = inlined_call_operand.hbm [shape: f32[32,128], index: 7, kind: input, shape index: {}]   ;;  %s3122_s8 = inlined_call_operand.vmem [shape: f32[1,128], index: 8, kind: input, shape index: {}]   ;;  %s3123_s9 = inlined_call_operand.hbm [shape: f32[8,2,128], index: 9, kind: output, shape index: {0}]   ;;  %s3124_s10 = inlined_call_operand.hbm [shape: f32[8,2,32], index: 10, kind: output, shape index: {1}]   ;;  %s3125_s11 = inlined_call_operand.hbm [shape: f32[2,32], index: 11, kind: output, shape index: {2}]   ;;  %s3126_s12 = inlined_call_operand.hbm [shape: f32[2,32], index: 12, kind: output, shape index: {3}]  }
   0x1   :  { %19 = vsyncpa [#allocation5], 0 }
   0x2   :  { %20 = vsyncpa [#allocation8], 0 }
   0x3   :  { %21 = vsyncpa [#allocation11], 0  ;;  %s2553_s21 = smov [#allocation3]   ;;  %s2435_s25 = scalar_lea.hbm %s3121_s7, 512 }
   0x4   :  { %s41_s22 = sshll.u32 %s2553_s21, 4  ;;  %p2436_p0 = scmp.ne.s32.totalorder %s3121_s7, %s2435_s25  ;;  %s42_s22 = int_to_ptr.vmem [resolvable:$true] %s41_s22 }
   0x5   :  { %p2439_p1 = scmp.lt.u32.totalorder %s2435_s25, %s3121_s7 }
   0x7   :  { %p2441_p2 = pnand %p2439_p1, %p2436_p0 }
   0x9   :  { %2444 = shalt.err (!%p2441_p2)
}
   0xa   :  { %s2445_s30 = scalar_lea.vmem %s42_s22, 512  ;;  %p2450_p4 = scmp.lt.s32.totalorder %s42_s22, %s42_s22 }
   0xb   :  { %p2446_p3 = scmp.ne.s32.totalorder %s42_s22, %s2445_s30  ;;  %p2451_p5 = scmp.lt.s32.totalorder %s2445_s30, %s2445_s30 }
   0xd   :  { %p2452_p6 = por %p2451_p5, %p2450_p4 }
   0xf   :  { %p2453_p7 = pnand %p2452_p6, %p2446_p3 }
  0x11   :  { %2456 = shalt.err (!%p2453_p7)
}
  0x12   :  { %s2554_s13 = smov 128   ;;  %s2555_s14 = smov 8  }
  0x13   :  { %47 = dma.hbm_to_vmem [thread:$0]  %s3121_s7, 512, %s42_s22, [#allocation4], %s2554_s13, %s2554_s13, %s2555_s14  }
  0x14   :  { %2545 = dma.done.wait [#allocation4], 512  }
  0x15   :  { %2546 = vsyncadd [#allocation4], 4294966784  ;;  %v2556_v0 = vmov 0.0|0.0   ;;  %vm2557_vm0 = vmmov 0   ;;  %v2558_v1 = vmov 0.0   ;;  %v2559_v2 = vmov 0  }
  0x16   :  { %2258 = vmatprep.subr.bf16.mxu0 %v2556_v0  ;;  %2090 = vmatprep.mubr.msk.f32.mxu0 %vm2557_vm0, %v2558_v1  ;;  %v139_v3 = vld [vmem:[%s3119_s5] sm:$0xff]  ;;  %v140_v4 = vld [vmem:[%s3119_s5 + $0x8] sm:$0xff]  ;;  %v141_v5 = vld [vmem:[%s3119_s5 + $0x10] sm:$0xff]  ;;  %s2560_s28 = smov 32   ;;  %vm146_vm1 = vcmask 261120   ;;  %s2561_s14 = smov 64  }
  0x17   :  { %2369 = vset.pattern.permute.xlu0 %v2559_v2  ;;  %2264 = vmatprep.subr.bf16.mxu1 %v2556_v0  ;;  %v2660_v6 = vpack.c.bf16 %v140_v4, %v139_v3  ;;  %v142_v7 = vld [vmem:[%s3119_s5 + $0x18] sm:$0xff]  ;;  %v53_v8 = vld [vmem:[%s3114_s0] sm:$0x3]  ;;  %v54_v23 = vld [vmem:[%s3114_s0 + $0x2] sm:$0x3]  ;;  %vm285_vm2 = vcmask 254976  }
  0x18   :  { %2101 = vmatprep.mubr.msk.f32.mxu1 %vm2557_vm0, %v2558_v1  ;;  %2370 = vset.pattern.permute.xlu1 %v2559_v2  ;;  %v2671_v9 = vld [vmem:[%s3117_s3] sm:$0x3]  ;;  %v2674_v10 = vpack.c.bf16 %v142_v7, %v141_v5  ;;  %v2741_v50 = vld [vmem:[%s3115_s1 + $0x2] sm:$0x3]  ;;  %v55_v55 = vld [vmem:[%s3114_s0 + $0x4] sm:$0x3] }
  0x19   :  { %64 = vperm.xlu0 %2369, %v53_v8   ;;  %2260 = vmatpush3.bf16.msra.mxu0 %v2660_v6  ;;  %v143_v11 = vld [vmem:[%s3116_s2] sm:$0x3] }
  0x1a   :  { %229 = vrot.lane.b32.xlu1 %v2671_v9, %s2560_s28  ;;  %2261 = vmatprep.subr.bf16.mxu0 %v2556_v0  ;;  %v2698_v12 = vld [vmem:[%s3118_s4] ss:$0 sm:$0xff] }
  0x1b   :  { %2266 = vmatpush3.bf16.msra.mxu1 %v2660_v6  ;;  %v2703_v13 = vld [vmem:[%s3120_s6] ss:$0 sm:$0xff]  ;;  %s2562_s6 = smov 96  }
  0x1c   :  { %2267 = vmatprep.subr.bf16.mxu1 %v2556_v0  ;;  %v2711_v22 = vld [vmem:[%s3115_s1] sm:$0x3] }
  0x1d   :  { %2263 = vmatpush3.bf16.msra.mxu0 %v2674_v10 }
  0x1e   :  { %2270 = vmatprep.subr.bf16.mxu0 %v2556_v0 }
  0x1f   :  { %2269 = vmatpush3.bf16.msra.mxu1 %v2674_v10 }
  0x20   :  { %2276 = vmatprep.subr.bf16.mxu1 %v2556_v0  ;;  %2091 = vmatmul.mubr.msk.f32.vlgmr.msra.gmra.mrb[0].mxu0 %vm146_vm1, %v143_v11 }
  0x21   :  { %2272 = vmatpush3.bf16.msra.mxu0 %v2660_v6  ;;  %2112 = vmatprep.mubr.msk.f32.mxu0 %vm2557_vm0, %v2558_v1 }
  0x22   :  { %2273 = vmatprep.subr.bf16.mxu0 %v2556_v0 }
  0x25   :  { %2275 = vmatpush3.bf16.msra.mxu0 %v2674_v10 }
  0x26   :  { %2282 = vmatprep.subr.bf16.mxu0 %v2556_v0 }
  0x8c   :  { %v230_v35 = vpop.permute.xlu1 %229 }
  0x98   :  { %v65_v14 = vpop.permute.xlu0 %64 }
  0x99   :  { %v108_v15 = vmul.f32 %v2698_v12, %v65_v14 }
  0x9b   :  { %v123_v16 = vadd.f32 %v2703_v13, %v108_v15 }
  0x9d   :  { %131 = vst [vmem:[#allocation2] sm:$0x3] %v123_v16 }
  0xa4   :  { %v145_v17 = vld [vmem:[#allocation2] sm:$0x3] }
  0xf3   :  { %v216_v18 = vpop.f32.mrb[0].mxu0 }
  0xf4   :  { %v220_v19 = vadd.f32 %v216_v18, %v145_v17  ;;  %v2092_v20 = vpop.f32.mrb[1].mxu0 }
  0xf6   :  { %2371 = vtanh.f32 %v220_v19  ;;  %v1971_v24 = vmul.f32 -1.442695, %v220_v19 }
  0xf8   :  { %2373 = vpow2.f32 %v1971_v24 }
 0x100   :  { %v2372_v21 = vpop.eup %2371 }
 0x101   :  { %234 = vrot.lane.b32.xlu0 %v2372_v21, %s2561_s14 }
 0x102   :  { %v2374_v25 = vpop.eup %2373 }
 0x103   :  { %v224_v26 = vadd.f32 1.0, %v2374_v25 }
 0x105   :  { %256 = vperm.xlu0 %2369, %v2711_v22   ;;  %2375 = vrcp.f32 %v224_v26  ;;  %v2773_v26 = vld [vmem:[%s3115_s1 + $0x4] sm:$0x3] }
 0x109   :  { %250 = vrot.lane.b32.xlu0 %v143_v11, %s2562_s6 }
 0x10d   :  { %69 = vperm.xlu0 %2369, %v54_v23  }
 0x10f   :  { %v2376_v27 = vpop.eup %2375 }
 0x110   :  { %v232_v36 = vmul.f32 %v2376_v27, %v230_v35 }
 0x173   :  { %v235_v28 = vpop.permute.xlu0 %234 }
 0x174   :  { %v237_v29 = vmul.f32 %v2376_v27, %v235_v28 }
 0x176   :  { %239 = vrot.lane.b32.xlu1 %v237_v29, %s2560_s28 }
 0x184   :  { %v2719_v30 = vpop.permute.xlu0 %256 }
 0x188   :  { %v251_v31 = vpop.permute.xlu0 %250 }
 0x18c   :  { %v70_v32 = vpop.permute.xlu0 %69 }
 0x18d   :  { %v109_v33 = vmul.f32 %v2698_v12, %v70_v32 }
 0x18f   :  { %v124_v34 = vadd.f32 %v2703_v13, %v109_v33 }
 0x191   :  { %132 = vst [vmem:[#allocation2 + $0x2] sm:$0x3] %v124_v34 }
 0x198   :  { %v288_v51 = vld [vmem:[#allocation2 + $0x2] sm:$0x3] }
 0x1e8   :  { %v240_v37 = vpop.permute.xlu1 %239 }
 0x1e9   :  { %v242_v38 = vadd.f32 %v240_v37, %v232_v36 }
 0x1eb   :  { %2377 = vtanh.f32 %v242_v38  ;;  %v265_v43 = vsub.f32 %v242_v38, %v230_v35 }
 0x1ed   :  { %v266_v45 = vmul.f32 %v265_v43, %v2719_v30 }
 0x1f5   :  { %v2378_v39 = vpop.eup %2377 }
 0x1f6   :  { %245 = vrot.lane.b32.xlu1 %v2378_v39, %s2561_s14 }
 0x268   :  { %v246_v40 = vpop.permute.xlu1 %245 }
 0x269   :  { %v2724_v41 = vmul.f32 %v2376_v27, %v246_v40  ;;  %v56_v27 = vld [vmem:[%s3114_s0 + $0x6] sm:$0x3] }
 0x26b   :  { %v253_v42 = vsub.f32 %v2724_v41, %v251_v31 }
 0x26d   :  { %v259_v44 = vmul.f32 %v2719_v30, %v253_v42 }
 0x26f   :  { %261 = vrot.lane.b32.xlu1 %v259_v44, %s2560_s28 }
 0x273   :  { %268 = vrot.lane.b32.xlu1 %v266_v45, %s2562_s6 }
 0x2e1   :  { %v262_v46 = vpop.permute.xlu1 %261 }
 0x2e2   :  { %v264_v47 = vadd.f32 %v262_v46, %v143_v11 }
 0x2e4   :  { %2102 = vmatmul.mubr.msk.f32.vlgmr.msra.gmra.mrb[0].mxu1 %vm146_vm1, %v264_v47 }
 0x2e5   :  { %v269_v48 = vpop.permute.xlu1 %268  ;;  %2278 = vmatpush3.bf16.msra.mxu1 %v2660_v6  ;;  %2123 = vmatprep.mubr.msk.f32.mxu1 %vm2557_vm0, %v2558_v1 }
 0x2e6   :  { %v271_v49 = vadd.f32 %v269_v48, %v2671_v9  ;;  %2279 = vmatprep.subr.bf16.mxu1 %v2556_v0 }
 0x2e8   :  { %371 = vrot.lane.b32.xlu1 %v271_v49, %s2560_s28 }
 0x2e9   :  { %2281 = vmatpush3.bf16.msra.mxu1 %v2674_v10 }
 0x2ea   :  { %2288 = vmatprep.subr.bf16.mxu1 %v2556_v0 }
 0x2ec   :  { %399 = vperm.xlu1 %2370, %v2741_v50  }
 0x2f0   :  { %393 = vrot.lane.b32.xlu1 %v264_v47, %s2562_s6 }
 0x2f4   :  { %74 = vperm.xlu1 %2370, %v55_v55  }
 0x35a   :  { %v372_v60 = vpop.permute.xlu1 %371 }
 0x36b   :  { %v2751_v61 = vpop.permute.xlu1 %399 }
 0x36f   :  { %v394_v62 = vpop.permute.xlu1 %393 }
 0x373   :  { %v75_v4 = vpop.permute.xlu1 %74 }
 0x374   :  { %v110_v5 = vmul.f32 %v2698_v12, %v75_v4 }
 0x376   :  { %v125_v7 = vadd.f32 %v2703_v13, %v110_v5 }
 0x378   :  { %133 = vst [vmem:[#allocation2 + $0x4] sm:$0x3] %v125_v7 }
 0x37f   :  { %v431_v35 = vld [vmem:[#allocation2 + $0x4] sm:$0x3] }
 0x3b7   :  { %v358_v52 = vpop.f32.mrb[0].mxu1 }
 0x3b8   :  { %v362_v53 = vadd.f32 %v358_v52, %v288_v51  ;;  %v2103_v54 = vpop.f32.mrb[1].mxu1 }
 0x3ba   :  { %2379 = vtanh.f32 %v362_v53  ;;  %v1973_v57 = vmul.f32 -1.442695, %v362_v53 }
 0x3bc   :  { %2381 = vpow2.f32 %v1973_v57 }
 0x3c4   :  { %v2380_v56 = vpop.eup %2379 }
 0x3c5   :  { %376 = vrot.lane.b32.xlu0 %v2380_v56, %s2561_s14 }
 0x3c6   :  { %v2382_v58 = vpop.eup %2381 }
 0x3c7   :  { %v366_v59 = vadd.f32 1.0, %v2382_v58 }
 0x3c9   :  { %2383 = vrcp.f32 %v366_v59 }
 0x3d3   :  { %v2384_v63 = vpop.eup %2383 }
 0x3d4   :  { %v374_v8 = vmul.f32 %v2384_v63, %v372_v60 }
 0x437   :  { %v377_v2 = vpop.permute.xlu0 %376 }
 0x438   :  { %v379_v3 = vmul.f32 %v2384_v63, %v377_v2  ;;  %v57_v2 = vld [vmem:[%s3114_s0 + $0x8] sm:$0x3] }
 0x43a   :  { %381 = vrot.lane.b32.xlu0 %v379_v3, %s2560_s28 }
 0x4ac   :  { %v382_v9 = vpop.permute.xlu0 %381 }
 0x4ad   :  { %v384_v11 = vadd.f32 %v382_v9, %v374_v8 }
 0x4af   :  { %2385 = vtanh.f32 %v384_v11  ;;  %v408_v18 = vsub.f32 %v384_v11, %v372_v60 }
 0x4b1   :  { %v409_v20 = vmul.f32 %v408_v18, %v2751_v61 }
 0x4b9   :  { %v2386_v14 = vpop.eup %2385 }
 0x4ba   :  { %387 = vrot.lane.b32.xlu0 %v2386_v14, %s2561_s14 }
 0x52c   :  { %v388_v15 = vpop.permute.xlu0 %387 }
 0x52d   :  { %v2757_v16 = vmul.f32 %v2384_v63, %v388_v15  ;;  %v2805_v63 = vld [vmem:[%s3115_s1 + $0x6] sm:$0x3] }
 0x52f   :  { %v396_v17 = vsub.f32 %v2757_v16, %v394_v62 }
 0x531   :  { %v402_v19 = vmul.f32 %v2751_v61, %v396_v17 }
 0x533   :  { %404 = vrot.lane.b32.xlu0 %v402_v19, %s2560_s28 }
 0x537   :  { %411 = vrot.lane.b32.xlu0 %v409_v20, %s2562_s6 }
 0x5a5   :  { %v405_v21 = vpop.permute.xlu0 %404 }
 0x5a6   :  { %v407_v23 = vadd.f32 %v405_v21, %v264_v47 }
 0x5a8   :  { %2113 = vmatmul.mubr.msk.f32.vlgmr.msra.gmra.mrb[2].mxu0 %vm146_vm1, %v407_v23 }
 0x5a9   :  { %v412_v24 = vpop.permute.xlu0 %411  ;;  %2284 = vmatpush3.bf16.msra.mxu0 %v2660_v6  ;;  %2134 = vmatprep.mubr.msk.f32.mxu0 %vm2557_vm0, %v2558_v1 }
 0x5aa   :  { %v414_v25 = vadd.f32 %v412_v24, %v271_v49  ;;  %2285 = vmatprep.subr.bf16.mxu0 %v2556_v0 }
 0x5ac   :  { %514 = vrot.lane.b32.xlu0 %v414_v25, %s2560_s28 }
 0x5ad   :  { %2287 = vmatpush3.bf16.msra.mxu0 %v2674_v10 }
 0x5ae   :  { %2294 = vmatprep.subr.bf16.mxu0 %v2556_v0 }
 0x5b0   :  { %542 = vperm.xlu0 %2369, %v2773_v26  }
 0x5b4   :  { %536 = vrot.lane.b32.xlu0 %v407_v23, %s2562_s6 }
 0x5b8   :  { %79 = vperm.xlu0 %2369, %v56_v27  }
 0x61e   :  { %v515_v28 = vpop.permute.xlu0 %514 }
 0x62f   :  { %v2782_v29 = vpop.permute.xlu0 %542 }
 0x633   :  { %v537_v31 = vpop.permute.xlu0 %536 }
 0x637   :  { %v80_v32 = vpop.permute.xlu0 %79 }
 0x638   :  { %v111_v33 = vmul.f32 %v2698_v12, %v80_v32 }
 0x63a   :  { %v126_v34 = vadd.f32 %v2703_v13, %v111_v33 }
 0x63c   :  { %134 = vst [vmem:[#allocation2 + $0x6] sm:$0x3] %v126_v34 }
 0x643   :  { %v574_v11 = vld [vmem:[#allocation2 + $0x6] sm:$0x3] }
 0x67b   :  { %v501_v36 = vpop.f32.mrb[2].mxu0 }
 0x67c   :  { %v505_v37 = vadd.f32 %v501_v36, %v431_v35  ;;  %v2114_v38 = vpop.f32.mrb[3].mxu0 }
 0x67e   :  { %2387 = vtanh.f32 %v505_v37  ;;  %v1976_v40 = vmul.f32 -1.442695, %v505_v37 }
 0x680   :  { %2389 = vpow2.f32 %v1976_v40 }
 0x688   :  { %v2388_v39 = vpop.eup %2387 }
 0x689   :  { %519 = vrot.lane.b32.xlu1 %v2388_v39, %s2561_s14 }
 0x68a   :  { %v2390_v42 = vpop.eup %2389 }
 0x68b   :  { %v509_v43 = vadd.f32 1.0, %v2390_v42 }
 0x68d   :  { %2391 = vrcp.f32 %v509_v43 }
 0x697   :  { %v2392_v44 = vpop.eup %2391 }
 0x698   :  { %v517_v47 = vmul.f32 %v2392_v44, %v515_v28 }
 0x6fb   :  { %v520_v45 = vpop.permute.xlu1 %519 }
 0x6fc   :  { %v522_v46 = vmul.f32 %v2392_v44, %v520_v45  ;;  %v58_v45 = vld [vmem:[%s3114_s0 + $0xa] sm:$0x3] }
 0x6fe   :  { %524 = vrot.lane.b32.xlu1 %v522_v46, %s2560_s28 }
 0x770   :  { %v525_v48 = vpop.permute.xlu1 %524 }
 0x771   :  { %v527_v49 = vadd.f32 %v525_v48, %v517_v47 }
 0x773   :  { %2393 = vtanh.f32 %v527_v49  ;;  %v551_v55 = vsub.f32 %v527_v49, %v515_v28 }
 0x775   :  { %v552_v57 = vmul.f32 %v551_v55, %v2782_v29 }
 0x77d   :  { %v2394_v51 = vpop.eup %2393 }
 0x77e   :  { %530 = vrot.lane.b32.xlu1 %v2394_v51, %s2561_s14 }
 0x7f0   :  { %v531_v52 = vpop.permute.xlu1 %530 }
 0x7f1   :  { %v2789_v53 = vmul.f32 %v2392_v44, %v531_v52  ;;  %v2837_v44 = vld [vmem:[%s3115_s1 + $0x8] sm:$0x3] }
 0x7f3   :  { %v539_v54 = vsub.f32 %v2789_v53, %v537_v31 }
 0x7f5   :  { %v545_v56 = vmul.f32 %v2782_v29, %v539_v54 }
 0x7f7   :  { %547 = vrot.lane.b32.xlu1 %v545_v56, %s2560_s28 }
 0x7fb   :  { %554 = vrot.lane.b32.xlu1 %v552_v57, %s2562_s6 }
 0x869   :  { %v548_v58 = vpop.permute.xlu1 %547 }
 0x86a   :  { %v550_v59 = vadd.f32 %v548_v58, %v407_v23 }
 0x86c   :  { %2124 = vmatmul.mubr.msk.f32.vlgmr.msra.gmra.mrb[2].mxu1 %vm146_vm1, %v550_v59 }
 0x86d   :  { %v555_v60 = vpop.permute.xlu1 %554  ;;  %2290 = vmatpush3.bf16.msra.mxu1 %v2660_v6  ;;  %2145 = vmatprep.mubr.msk.f32.mxu1 %vm2557_vm0, %v2558_v1 }
 0x86e   :  { %v557_v62 = vadd.f32 %v555_v60, %v414_v25  ;;  %2291 = vmatprep.subr.bf16.mxu1 %v2556_v0 }
 0x870   :  { %657 = vrot.lane.b32.xlu1 %v557_v62, %s2560_s28 }
 0x871   :  { %2293 = vmatpush3.bf16.msra.mxu1 %v2674_v10 }
 0x872   :  { %2300 = vmatprep.subr.bf16.mxu1 %v2556_v0 }
 0x874   :  { %685 = vperm.xlu1 %2370, %v2805_v63  }
 0x878   :  { %679 = vrot.lane.b32.xlu1 %v550_v59, %s2562_s6 }
 0x87c   :  { %84 = vperm.xlu1 %2370, %v57_v2  }
 0x8e2   :  { %v658_v3 = vpop.permute.xlu1 %657 }
 0x8f3   :  { %v2814_v4 = vpop.permute.xlu1 %685 }
 0x8f7   :  { %v680_v5 = vpop.permute.xlu1 %679 }
 0x8fb   :  { %v85_v7 = vpop.permute.xlu1 %84 }
 0x8fc   :  { %v112_v8 = vmul.f32 %v2698_v12, %v85_v7 }
 0x8fe   :  { %v127_v9 = vadd.f32 %v2703_v13, %v112_v8 }
 0x900   :  { %135 = vst [vmem:[#allocation2 + $0x8] sm:$0x3] %v127_v9 }
 0x907   :  { %v717_v54 = vld [vmem:[#allocation2 + $0x8] sm:$0x3] }
 0x93f   :  { %v644_v14 = vpop.f32.mrb[2].mxu1 }
 0x940   :  { %v648_v15 = vadd.f32 %v644_v14, %v574_v11  ;;  %v2125_v17 = vpop.f32.mrb[3].mxu1 }
 0x942   :  { %2395 = vtanh.f32 %v648_v15  ;;  %v1979_v19 = vmul.f32 -1.442695, %v648_v15 }
 0x944   :  { %2397 = vpow2.f32 %v1979_v19 }
 0x94c   :  { %v2396_v18 = vpop.eup %2395 }
 0x94d   :  { %662 = vrot.lane.b32.xlu0 %v2396_v18, %s2561_s14 }
 0x94e   :  { %v2398_v20 = vpop.eup %2397 }
 0x94f   :  { %v652_v21 = vadd.f32 1.0, %v2398_v20 }
 0x951   :  { %2399 = vrcp.f32 %v652_v21 }
 0x95b   :  { %v2400_v23 = vpop.eup %2399 }
 0x95c   :  { %v660_v27 = vmul.f32 %v2400_v23, %v658_v3 }
 0x9bf   :  { %v663_v24 = vpop.permute.xlu0 %662 }
 0x9c0   :  { %v665_v25 = vmul.f32 %v2400_v23, %v663_v24 }
 0x9c2   :  { %667 = vrot.lane.b32.xlu0 %v665_v25, %s2560_s28 }
 0xa34   :  { %v668_v28 = vpop.permute.xlu0 %667 }
 0xa35   :  { %v670_v31 = vadd.f32 %v668_v28, %v660_v27  ;;  %v2869_v27 = vld [vmem:[%s3115_s1 + $0xa] sm:$0x3] }
 0xa37   :  { %2401 = vtanh.f32 %v670_v31  ;;  %v694_v36 = vsub.f32 %v670_v31, %v658_v3 }
 0xa39   :  { %v695_v38 = vmul.f32 %v694_v36, %v2814_v4 }
 0xa41   :  { %v2402_v32 = vpop.eup %2401 }
 0xa42   :  { %673 = vrot.lane.b32.xlu0 %v2402_v32, %s2561_s14 }
 0xab4   :  { %v674_v33 = vpop.permute.xlu0 %673 }
 0xab5   :  { %v2821_v34 = vmul.f32 %v2400_v23, %v674_v33 }
 0xab7   :  { %v682_v35 = vsub.f32 %v2821_v34, %v680_v5 }
 0xab9   :  { %v688_v37 = vmul.f32 %v2814_v4, %v682_v35 }
 0xabb   :  { %690 = vrot.lane.b32.xlu0 %v688_v37, %s2560_s28 }
 0xabf   :  { %697 = vrot.lane.b32.xlu0 %v695_v38, %s2562_s6 }
 0xb2d   :  { %v691_v39 = vpop.permute.xlu0 %690 }
 0xb2e   :  { %v693_v40 = vadd.f32 %v691_v39, %v550_v59 }
 0xb30   :  { %2135 = vmatmul.mubr.msk.f32.vlgmr.msra.gmra.mrb[4].mxu0 %vm146_vm1, %v693_v40 }
 0xb31   :  { %v698_v42 = vpop.permute.xlu0 %697  ;;  %2296 = vmatpush3.bf16.msra.mxu0 %v2660_v6  ;;  %2156 = vmatprep.mubr.msk.f32.mxu0 %vm2557_vm0, %v2558_v1 }
 0xb32   :  { %v700_v43 = vadd.f32 %v698_v42, %v557_v62  ;;  %2297 = vmatprep.subr.bf16.mxu0 %v2556_v0 }
 0xb34   :  { %800 = vrot.lane.b32.xlu0 %v700_v43, %s2560_s28 }
 0xb35   :  { %2299 = vmatpush3.bf16.msra.mxu0 %v2674_v10 }
 0xb36   :  { %2306 = vmatprep.subr.bf16.mxu0 %v2556_v0 }
 0xb38   :  { %828 = vperm.xlu0 %2369, %v2837_v44  }
 0xb3c   :  { %822 = vrot.lane.b32.xlu0 %v693_v40, %s2562_s6 }
 0xb40   :  { %89 = vperm.xlu0 %2369, %v58_v45  }
 0xba6   :  { %v801_v46 = vpop.permute.xlu0 %800 }
 0xbb7   :  { %v2846_v47 = vpop.permute.xlu0 %828 }
 0xbbb   :  { %v823_v48 = vpop.permute.xlu0 %822 }
 0xbbf   :  { %v90_v49 = vpop.permute.xlu0 %89 }
 0xbc0   :  { %v113_v51 = vmul.f32 %v2698_v12, %v90_v49 }
 0xbc2   :  { %v128_v52 = vadd.f32 %v2703_v13, %v113_v51 }
 0xbc4   :  { %136 = vst [vmem:[#allocation2 + $0xa] sm:$0x3] %v128_v52 }
 0xbcb   :  { %v860_v36 = vld [vmem:[#allocation2 + $0xa] sm:$0x3] }
 0xc03   :  { %v787_v55 = vpop.f32.mrb[4].mxu0 }
 0xc04   :  { %v791_v56 = vadd.f32 %v787_v55, %v717_v54  ;;  %v2136_v57 = vpop.f32.mrb[5].mxu0 }
 0xc06   :  { %2403 = vtanh.f32 %v791_v56  ;;  %v1982_v59 = vmul.f32 -1.442695, %v791_v56 }
 0xc08   :  { %2405 = vpow2.f32 %v1982_v59 }
 0xc10   :  { %v2404_v58 = vpop.eup %2403 }
 0xc11   :  { %805 = vrot.lane.b32.xlu1 %v2404_v58, %s2561_s14 }
 0xc12   :  { %v2406_v60 = vpop.eup %2405 }
 0xc13   :  { %v795_v62 = vadd.f32 1.0, %v2406_v60 }
 0xc15   :  { %2407 = vrcp.f32 %v795_v62 }
 0xc1f   :  { %v2408_v2 = vpop.eup %2407 }
 0xc20   :  { %v803_v7 = vmul.f32 %v2408_v2, %v801_v46 }
 0xc83   :  { %v806_v3 = vpop.permute.xlu1 %805 }
 0xc84   :  { %v808_v5 = vmul.f32 %v2408_v2, %v806_v3 }
 0xc86   :  { %810 = vrot.lane.b32.xlu1 %v808_v5, %s2560_s28 }
 0xcf8   :  { %v811_v8 = vpop.permute.xlu1 %810 }
 0xcf9   :  { %v813_v9 = vadd.f32 %v811_v8, %v803_v7  ;;  %v2899_v8 = vld [vmem:[%s3115_s1 + $0xc] sm:$0x3] }
 0xcfb   :  { %2409 = vtanh.f32 %v813_v9  ;;  %v837_v18 = vsub.f32 %v813_v9, %v801_v46  ;;  %v60_v9 = vld [vmem:[%s3114_s0 + $0xe] sm:$0x3] }
 0xcfd   :  { %v838_v20 = vmul.f32 %v837_v18, %v2846_v47 }
 0xd05   :  { %v2410_v11 = vpop.eup %2409 }
 0xd06   :  { %816 = vrot.lane.b32.xlu1 %v2410_v11, %s2561_s14 }
 0xd78   :  { %v817_v14 = vpop.permute.xlu1 %816 }
 0xd79   :  { %v2853_v15 = vmul.f32 %v2408_v2, %v817_v14 }
 0xd7b   :  { %v825_v17 = vsub.f32 %v2853_v15, %v823_v48 }
 0xd7d   :  { %v831_v19 = vmul.f32 %v2846_v47, %v825_v17 }
 0xd7f   :  { %833 = vrot.lane.b32.xlu1 %v831_v19, %s2560_s28 }
 0xd83   :  { %840 = vrot.lane.b32.xlu1 %v838_v20, %s2562_s6 }
 0xdf1   :  { %v834_v21 = vpop.permute.xlu1 %833 }
 0xdf2   :  { %v836_v23 = vadd.f32 %v834_v21, %v693_v40 }
 0xdf4   :  { %2146 = vmatmul.mubr.msk.f32.vlgmr.msra.gmra.mrb[4].mxu1 %vm146_vm1, %v836_v23 }
 0xdf5   :  { %v841_v24 = vpop.permute.xlu1 %840  ;;  %2302 = vmatpush3.bf16.msra.mxu1 %v2660_v6  ;;  %2167 = vmatprep.mubr.msk.f32.mxu1 %vm2557_vm0, %v2558_v1  ;;  %v59_v6 = vld [vmem:[%s3114_s0 + $0xc] sm:$0x3] }
 0xdf6   :  { %v843_v25 = vadd.f32 %v841_v24, %v700_v43  ;;  %2303 = vmatprep.subr.bf16.mxu1 %v2556_v0 }
 0xdf8   :  { %943 = vrot.lane.b32.xlu1 %v843_v25, %s2560_s28 }
 0xdf9   :  { %2305 = vmatpush3.bf16.msra.mxu1 %v2674_v10 }
 0xdfa   :  { %2312 = vmatprep.subr.bf16.mxu1 %v2556_v0 }
 0xdfc   :  { %971 = vperm.xlu1 %2370, %v2869_v27  }
 0xe00   :  { %965 = vrot.lane.b32.xlu1 %v836_v23, %s2562_s6 }
 0xe04   :  { %94 = vperm.xlu1 %2370, %v59_v6  }
 0xe6a   :  { %v944_v28 = vpop.permute.xlu1 %943 }
 0xe7b   :  { %v2878_v31 = vpop.permute.xlu1 %971 }
 0xe7f   :  { %v966_v32 = vpop.permute.xlu1 %965 }
 0xe83   :  { %v95_v33 = vpop.permute.xlu1 %94 }
 0xe84   :  { %v114_v35 = vmul.f32 %v2698_v12, %v95_v33 }
 0xe86   :  { %v129_v10 = vadd.f32 %v2703_v13, %v114_v35 }
 0xe88   :  { %137 = vst [vmem:[#allocation2 + $0xc] sm:$0x3] %v129_v10 }
 0xe8f   :  { %v1003_v21 = vld [vmem:[#allocation2 + $0xc] sm:$0x3] }
 0xec7   :  { %v930_v37 = vpop.f32.mrb[4].mxu1 }
 0xec8   :  { %v934_v38 = vadd.f32 %v930_v37, %v860_v36  ;;  %v2147_v39 = vpop.f32.mrb[5].mxu1 }
 0xeca   :  { %2411 = vtanh.f32 %v934_v38  ;;  %v1985_v42 = vmul.f32 -1.442695, %v934_v38 }
 0xecc   :  { %2413 = vpow2.f32 %v1985_v42 }
 0xed4   :  { %v2412_v40 = vpop.eup %2411 }
 0xed5   :  { %948 = vrot.lane.b32.xlu0 %v2412_v40, %s2561_s14 }
 0xed6   :  { %v2414_v43 = vpop.eup %2413 }
 0xed7   :  { %v938_v45 = vadd.f32 1.0, %v2414_v43 }
 0xed9   :  { %2415 = vrcp.f32 %v938_v45 }
 0xee3   :  { %v2416_v46 = vpop.eup %2415 }
 0xee4   :  { %v946_v51 = vmul.f32 %v2416_v46, %v944_v28 }
 0xf47   :  { %v949_v48 = vpop.permute.xlu0 %948 }
 0xf48   :  { %v951_v49 = vmul.f32 %v2416_v46, %v949_v48 }
 0xf4a   :  { %953 = vrot.lane.b32.xlu0 %v951_v49, %s2560_s28 }
 0xfbc   :  { %v954_v52 = vpop.permute.xlu0 %953 }
 0xfbd   :  { %v956_v54 = vadd.f32 %v954_v52, %v946_v51  ;;  %v273_v51 = vsub.f32 1.0, %v2711_v22 }
 0xfbf   :  { %2417 = vtanh.f32 %v956_v54  ;;  %v980_v59 = vsub.f32 %v956_v54, %v944_v28 }
 0xfc1   :  { %v981_v62 = vmul.f32 %v980_v59, %v2878_v31  ;;  %v845_v59 = vsub.f32 1.0, %v2837_v44  ;;  %v1292_v44 = vld [vmem:[#allocation3 + $0x10] sm:$0xff] }
 0xfc3   :  { %v846_v22 = vmul.f32 0.0, %v845_v59 }
 0xfc9   :  { %v2418_v55 = vpop.eup %2417 }
 0xfca   :  { %959 = vrot.lane.b32.xlu0 %v2418_v55, %s2561_s14  ;;  %v274_v55 = vmul.f32 0.0, %v273_v51 }
0x103c   :  { %v960_v56 = vpop.permute.xlu0 %959 }
0x103d   :  { %v2885_v57 = vmul.f32 %v2416_v46, %v960_v56  ;;  %v559_v56 = vsub.f32 1.0, %v2773_v26  ;;  %v1291_v26 = vld [vmem:[#allocation3 + $0x8] sm:$0xff] }
0x103f   :  { %v968_v58 = vsub.f32 %v2885_v57, %v966_v32 }
0x1041   :  { %v974_v60 = vmul.f32 %v2878_v31, %v968_v58  ;;  %v560_v58 = vmul.f32 0.0, %v559_v56  ;;  %v1131_v56 = vsub.f32 1.0, %v2899_v8 }
0x1043   :  { %976 = vrot.lane.b32.xlu0 %v974_v60, %s2560_s28  ;;  %v1992_v60 = vld [vmem:[%s3115_s1 + $0xe] sm:$0x3] }
0x1047   :  { %983 = vrot.lane.b32.xlu0 %v981_v62, %s2562_s6  ;;  %v1274_v62 = vsub.f32 1.0, %v1992_v60 }
0x10b5   :  { %v977_v2 = vpop.permute.xlu0 %976 }
0x10b6   :  { %v979_v3 = vadd.f32 %v977_v2, %v836_v23  ;;  %v1275_v2 = vmul.f32 0.0, %v1274_v62 }
0x10b8   :  { %2157 = vmatmul.mubr.msk.f32.vlgmr.msra.gmra.mrb[6].mxu0 %vm146_vm1, %v979_v3 }
0x10b9   :  { %v984_v5 = vpop.permute.xlu0 %983  ;;  %2178 = vmatprep.mubr.msk.f32.mxu0 %vm2557_vm0, %v2558_v1 }
0x10ba   :  { %v986_v7 = vadd.f32 %v984_v5, %v843_v25 }
0x10bc   :  { %1086 = vrot.lane.b32.xlu0 %v986_v7, %s2560_s28 }
0x10c0   :  { %1114 = vperm.xlu0 %2369, %v2899_v8   ;;  %v415_v8 = vmul.f32 %v2751_v61, %v2757_v16 }
0x10c4   :  { %1108 = vrot.lane.b32.xlu0 %v979_v3, %s2562_s6 }
0x10c8   :  { %99 = vperm.xlu0 %2369, %v60_v9  }
0x112e   :  { %v1087_v11 = vpop.permute.xlu0 %1086 }
0x113f   :  { %v2906_v14 = vpop.permute.xlu0 %1114 }
0x1143   :  { %v1109_v17 = vpop.permute.xlu0 %1108 }
0x1147   :  { %v100_v18 = vpop.permute.xlu0 %99 }
0x1148   :  { %v115_v19 = vmul.f32 %v2698_v12, %v100_v18 }
0x114a   :  { %v130_v20 = vadd.f32 %v2703_v13, %v115_v19 }
0x114c   :  { %138 = vst [vmem:[#allocation2 + $0xe] sm:$0x3] %v130_v20  ;;  %v558_v20 = vmul.f32 %v2782_v29, %v2789_v53 }
0x118b   :  { %v1073_v23 = vpop.f32.mrb[6].mxu0 }
0x118c   :  { %v1077_v24 = vadd.f32 %v1073_v23, %v1003_v21  ;;  %v2158_v25 = vpop.f32.mrb[7].mxu0 }
0x118e   :  { %2419 = vtanh.f32 %v1077_v24  ;;  %v1988_v28 = vmul.f32 -1.442695, %v1077_v24  ;;  %v844_v24 = vmul.f32 %v2846_v47, %v2853_v15 }
0x1190   :  { %2421 = vpow2.f32 %v1988_v28  ;;  %v1146_v28 = vld [vmem:[#allocation2 + $0xe] sm:$0x3] }
0x1198   :  { %v2420_v6 = vpop.eup %2419 }
0x1199   :  { %1091 = vrot.lane.b32.xlu1 %v2420_v6, %s2561_s14 }
0x119a   :  { %v2422_v32 = vpop.eup %2421 }
0x119b   :  { %v1081_v33 = vadd.f32 1.0, %v2422_v32 }
0x119d   :  { %2423 = vrcp.f32 %v1081_v33 }
0x11a7   :  { %v2424_v35 = vpop.eup %2423 }
0x11a8   :  { %v1089_v12 = vmul.f32 %v2424_v35, %v1087_v11 }
0x120b   :  { %v1092_v10 = vpop.permute.xlu1 %1091 }
0x120c   :  { %v1094_v36 = vmul.f32 %v2424_v35, %v1092_v10 }
0x120e   :  { %1096 = vrot.lane.b32.xlu1 %v1094_v36, %s2560_s28 }
0x1280   :  { %v1097_v13 = vpop.permute.xlu1 %1096 }
0x1281   :  { %v1099_v37 = vadd.f32 %v1097_v13, %v1089_v12 }
0x1283   :  { %2425 = vtanh.f32 %v1099_v37  ;;  %v1123_v43 = vsub.f32 %v1099_v37, %v1087_v11 }
0x1285   :  { %v1124_v46 = vmul.f32 %v1123_v43, %v2906_v14 }
0x128d   :  { %v2426_v38 = vpop.eup %2425 }
0x128e   :  { %1102 = vrot.lane.b32.xlu1 %v2426_v38, %s2561_s14 }
0x1300   :  { %v1103_v39 = vpop.permute.xlu1 %1102 }
0x1301   :  { %v2913_v40 = vmul.f32 %v2424_v35, %v1103_v39  ;;  %v416_v39 = vsub.f32 1.0, %v2741_v50 }
0x1303   :  { %v1111_v42 = vsub.f32 %v2913_v40, %v1109_v17  ;;  %v272_v17 = vmul.f32 %v2719_v30, %v2724_v41 }
0x1305   :  { %v1117_v45 = vmul.f32 %v2906_v14, %v1111_v42 }
0x1307   :  { %1119 = vrot.lane.b32.xlu1 %v1117_v45, %s2560_s28 }
0x130b   :  { %1126 = vrot.lane.b32.xlu1 %v1124_v46, %s2562_s6  ;;  %v417_v46 = vmul.f32 0.0, %v416_v39 }
0x1379   :  { %v1120_v48 = vpop.permute.xlu1 %1119 }
0x137a   :  { %v2920_v49 = vadd.f32 %v1120_v48, %v979_v3  ;;  %v1290_v3 = vld [vmem:[#allocation3] sm:$0xff]  ;;  %v702_v48 = vsub.f32 1.0, %v2805_v63  ;;  %v2997_v63 = vld [vmem:[%s3122_s8] ss:$0 sm:$0xff]  ;;  %s2563_s8 = smov [#allocation7]  }
0x137b   :  { %v2936_v5 = vpack.c.bf16 %v1291_v26, %v1290_v3 }
0x137c   :  { %2168 = vmatmul.mubr.msk.f32.vlgmr.msra.gmra.mrb[6].mxu1 %vm146_vm1, %v2920_v49  ;;  %v703_v51 = vmul.f32 0.0, %v702_v48 }
0x137d   :  { %v1127_v52 = vpop.permute.xlu1 %1126  ;;  %2189 = vmatprep.mubr.msk.f32.mxu1 %vm2557_vm0, %v2558_v1  ;;  %2308 = vmatpush3.bf16.msra.mxu0 %v2936_v5 }
0x137e   :  { %v2927_v54 = vadd.f32 %v1127_v52, %v986_v7  ;;  %2314 = vmatpush3.bf16.msra.mxu1 %v2936_v5  ;;  %2309 = vmatprep.subr.bf16.mxu0 %v2556_v0  ;;  %v1293_v7 = vld [vmem:[#allocation3 + $0x18] sm:$0xff]  ;;  %v988_v52 = vsub.f32 1.0, %v2869_v27 }
0x137f   :  { %2315 = vmatprep.subr.bf16.mxu1 %v2556_v0  ;;  %v2942_v9 = vpack.c.bf16 %v1293_v7, %v1292_v44  ;;  %v701_v44 = vmul.f32 %v2814_v4, %v2821_v34 }
0x1380   :  { %1229 = vrot.lane.b32.xlu1 %v2927_v54, %s2560_s28 }
0x1381   :  { %2311 = vmatpush3.bf16.msra.mxu0 %v2942_v9 }
0x1382   :  { %2317 = vmatpush3.bf16.msra.mxu1 %v2942_v9  ;;  %2318 = vmatprep.subr.bf16.mxu0 %v2556_v0 }
0x1383   :  { %2324 = vmatprep.subr.bf16.mxu1 %v2556_v0 }
0x1384   :  { %277 = vperm.xlu1 %2370, %v274_v55   ;;  %v989_v55 = vmul.f32 0.0, %v988_v52 }
0x1388   :  { %563 = vperm.xlu1 %2370, %v560_v58   ;;  %v1132_v58 = vmul.f32 0.0, %v1131_v56 }
0x138c   :  { %849 = vperm.xlu1 %2370, %v846_v22  }
0x1390   :  { %1257 = vperm.xlu1 %2370, %v1992_v60  }
0x1394   :  { %1278 = vperm.xlu1 %2370, %v1275_v2  }
0x13f2   :  { %v2948_v11 = vpop.permute.xlu1 %1229 }
0x1403   :  { %v278_v18 = vpop.permute.xlu1 %277 }
0x1404   :  { %v280_v19 = vadd.f32 %v278_v18, %v272_v17 }
0x1406   :  { %282 = vrot.lane.b32.xlu1 %v280_v19, %s2560_s28  ;;  %v987_v19 = vmul.f32 %v2878_v31, %v2885_v57 }
0x1407   :  { %v564_v21 = vpop.permute.xlu1 %563 }
0x1408   :  { %v566_v23 = vadd.f32 %v564_v21, %v558_v20 }
0x140a   :  { %568 = vrot.lane.b32.xlu1 %v566_v23, %s2560_s28  ;;  %v1130_v23 = vmul.f32 %v2906_v14, %v2913_v40 }
0x140b   :  { %v850_v25 = vpop.permute.xlu1 %849 }
0x140c   :  { %v852_v6 = vadd.f32 %v850_v25, %v844_v24 }
0x140e   :  { %854 = vrot.lane.b32.xlu1 %v852_v6, %s2560_s28 }
0x140f   :  { %v2960_v29 = vpop.permute.xlu1 %1257 }
0x1413   :  { %v2962_v53 = vpop.permute.xlu1 %1278 }
0x144f   :  { %v1216_v30 = vpop.f32.mrb[6].mxu1 }
0x1450   :  { %v1220_v41 = vadd.f32 %v1216_v30, %v1146_v28  ;;  %v2169_v32 = vpop.f32.mrb[7].mxu1 }
0x1452   :  { %2427 = vtanh.f32 %v1220_v41  ;;  %v1991_v13 = vmul.f32 -1.442695, %v1220_v41 }
0x1454   :  { %2429 = vpow2.f32 %v1991_v13 }
0x145c   :  { %v2428_v33 = vpop.eup %2427 }
0x145d   :  { %1234 = vrot.lane.b32.xlu0 %v2428_v33, %s2561_s14 }
0x145e   :  { %v2430_v37 = vpop.eup %2429 }
0x145f   :  { %v1224_v38 = vadd.f32 1.0, %v2430_v37 }
0x1461   :  { %2431 = vrcp.f32 %v1224_v38 }
0x146b   :  { %v2432_v42 = vpop.eup %2431 }
0x146c   :  { %v1232_v50 = vmul.f32 %v2432_v42, %v2948_v11 }
0x1478   :  { %v283_v35 = vpop.permute.xlu1 %282 }
0x1479   :  { %286 = vst.msk [vmem:[#allocation7] sm:$0x3] %vm285_vm2, %v283_v35 }
0x147c   :  { %v569_v47 = vpop.permute.xlu1 %568 }
0x147d   :  { %572 = vst.msk [vmem:[#allocation7 + $0x4] sm:$0x3] %vm285_vm2, %v569_v47 }
0x1480   :  { %v855_v15 = vpop.permute.xlu1 %854  ;;  %v1295_v10 = vld [vmem:[#allocation7] sm:$0x3] }
0x1481   :  { %858 = vst.msk [vmem:[#allocation7 + $0x8] sm:$0x3] %vm285_vm2, %v855_v15  ;;  %2179 = vmatmul.mubr.msk.f32.vlgmr.msra.gmra.mrb[8].mxu0 %vm146_vm1, %v1295_v10 }
0x1482   :  { %2320 = vmatpush3.bf16.msra.mxu0 %v2936_v5  ;;  %2200 = vmatprep.mubr.msk.f32.mxu0 %vm2557_vm0, %v2558_v1 }
0x1483   :  { %2321 = vmatprep.subr.bf16.mxu0 %v2556_v0 }
0x1484   :  { %v1452_v36 = vld [vmem:[#allocation7 + $0x4] sm:$0x3] }
0x1486   :  { %2323 = vmatpush3.bf16.msra.mxu0 %v2942_v9 }
0x1487   :  { %2330 = vmatprep.subr.bf16.mxu0 %v2556_v0 }
0x1488   :  { %v1604_v12 = vld [vmem:[#allocation7 + $0x8] sm:$0x3] }
0x1489   :  { %2201 = vmatmul.mubr.msk.f32.vlgmr.msra.gmra.mrb[10].mxu0 %vm146_vm1, %v1452_v36 }
0x148a   :  { %2332 = vmatpush3.bf16.msra.mxu0 %v2936_v5  ;;  %2222 = vmatprep.mubr.msk.f32.mxu0 %vm2557_vm0, %v2558_v1 }
0x148b   :  { %2333 = vmatprep.subr.bf16.mxu0 %v2556_v0 }
0x148e   :  { %2335 = vmatpush3.bf16.msra.mxu0 %v2942_v9 }
0x148f   :  { %2342 = vmatprep.subr.bf16.mxu0 %v2556_v0 }
0x1491   :  { %2223 = vmatmul.mubr.msk.f32.vlgmr.msra.gmra.mrb[12].mxu0 %vm146_vm1, %v1604_v12 }
0x1492   :  { %2344 = vmatpush3.bf16.msra.mxu0 %v2936_v5  ;;  %2244 = vmatprep.mubr.msk.f32.mxu0 %vm2557_vm0, %v2558_v1 }
0x1493   :  { %2345 = vmatprep.subr.bf16.mxu0 %v2556_v0 }
0x1496   :  { %2347 = vmatpush3.bf16.msra.mxu0 %v2942_v9 }
0x14cf   :  { %v1235_v43 = vpop.permute.xlu0 %1234 }
0x14d0   :  { %v1237_v45 = vmul.f32 %v2432_v42, %v1235_v43 }
0x14d2   :  { %1239 = vrot.lane.b32.xlu0 %v1237_v45, %s2560_s28 }
0x14d6   :  { %420 = vperm.xlu0 %2369, %v417_v46  }
0x14da   :  { %706 = vperm.xlu0 %2369, %v703_v51  }
0x14de   :  { %992 = vperm.xlu0 %2369, %v989_v55  }
0x14e2   :  { %1135 = vperm.xlu0 %2369, %v1132_v58  }
0x1544   :  { %v1240_v59 = vpop.permute.xlu0 %1239 }
0x1545   :  { %v1242_v22 = vadd.f32 %v1240_v59, %v1232_v50 }
0x1547   :  { %2433 = vtanh.f32 %v1242_v22  ;;  %v1266_v31 = vsub.f32 %v1242_v22, %v2948_v11 }
0x1549   :  { %v1267_v57 = vmul.f32 %v1266_v31, %v2960_v29 }
0x1551   :  { %v2434_v60 = vpop.eup %2433 }
0x1552   :  { %1245 = vrot.lane.b32.xlu0 %v2434_v60, %s2561_s14  ;;  %s1925_s14 = sshll.u32 %s2563_s8, 4  ;;  %s1926_s14 = int_to_ptr.vmem [resolvable:$true] %s1925_s14 }
0x1553   :  { %p2462_p9 = scmp.lt.s32.totalorder %s1926_s14, %s1926_s14 }
0x1554   :  { %v1371_v27 = vpop.f32.mrb[8].mxu0 }
0x1555   :  { %v1372_v62 = vadd.f32 %v2997_v63, %v1371_v27  ;;  %v421_v2 = vpop.permute.xlu0 %420  ;;  %v2180_v3 = vpop.f32.mrb[9].mxu0 }
0x1556   :  { %v423_v26 = vadd.f32 %v421_v2, %v415_v8 }
0x1557   :  { %1375 = vst [vmem:[#allocation6] sm:$0x3] %v1372_v62 }
0x1558   :  { %425 = vrot.lane.b32.xlu0 %v423_v26, %s2560_s28 }
0x1559   :  { %v707_v7 = vpop.permute.xlu0 %706 }
0x155a   :  { %v709_v17 = vadd.f32 %v707_v7, %v701_v44 }
0x155c   :  { %v1522_v18 = vpop.f32.mrb[10].mxu0  ;;  %711 = vrot.lane.b32.xlu0 %v709_v17, %s2560_s28 }
0x155d   :  { %v1523_v61 = vadd.f32 %v2997_v63, %v1522_v18  ;;  %v2202_v16 = vpop.f32.mrb[11].mxu0  ;;  %v993_v20 = vpop.permute.xlu0 %992 }
0x155e   :  { %v995_v21 = vadd.f32 %v993_v20, %v987_v19 }
0x155f   :  { %1527 = vst [vmem:[#allocation6 + $0x4] sm:$0x3] %v1523_v61 }
0x1560   :  { %997 = vrot.lane.b32.xlu0 %v995_v21, %s2560_s28 }
0x1561   :  { %v1136_v4 = vpop.permute.xlu0 %1135 }
0x1562   :  { %v1138_v34 = vadd.f32 %v1136_v4, %v1130_v23 }
0x1564   :  { %v1674_v24 = vpop.f32.mrb[12].mxu0  ;;  %1140 = vrot.lane.b32.xlu1 %v1138_v34, %s2560_s28 }
0x1565   :  { %v1675_v25 = vadd.f32 %v2997_v63, %v1674_v24  ;;  %v2224_v6 = vpop.f32.mrb[13].mxu0 }
0x1567   :  { %1679 = vst [vmem:[#allocation6 + $0x8] sm:$0x3] %v1675_v25 }
0x1568   :  { %1251 = vrot.lane.b32.xlu1 %v2920_v49, %s2562_s6 }
0x156c   :  { %1269 = vrot.lane.b32.xlu1 %v1267_v57, %s2562_s6  ;;  %s2457_s6 = scalar_lea.vmem %s1926_s14, 256 }
0x156d   :  { %p2458_p8 = scmp.ne.s32.totalorder %s1926_s14, %s2457_s6  ;;  %p2463_p10 = scmp.lt.s32.totalorder %s2457_s6, %s2457_s6 }
0x156f   :  { %p2464_p11 = por %p2463_p10, %p2462_p9 }
0x1571   :  { %p2465_p12 = pnand %p2464_p11, %p2458_p8 }
0x15c4   :  { %v1246_v28 = vpop.permute.xlu0 %1245 }
0x15c5   :  { %v1248_v14 = vmul.f32 %v2432_v42, %v1246_v28 }
0x15c7   :  { %v1273_v40 = vmul.f32 %v2960_v29, %v1248_v14 }
0x15c9   :  { %v1281_v30 = vadd.f32 %v2962_v53, %v1273_v40 }
0x15ca   :  { %v426_v41 = vpop.permute.xlu0 %425 }
0x15cb   :  { %429 = vst.msk [vmem:[#allocation7 + $0x2] sm:$0x3] %vm285_vm2, %v426_v41  ;;  %1283 = vrot.lane.b32.xlu0 %v1281_v30, %s2560_s28 }
0x15ce   :  { %v712_v11 = vpop.permute.xlu0 %711 }
0x15cf   :  { %715 = vst.msk [vmem:[#allocation7 + $0x6] sm:$0x3] %vm285_vm2, %v712_v11 }
0x15d2   :  { %v998_v32 = vpop.permute.xlu0 %997  ;;  %v1376_v33 = vld [vmem:[#allocation7 + $0x2] sm:$0x3] }
0x15d3   :  { %1001 = vst.msk [vmem:[#allocation7 + $0xa] sm:$0x3] %vm285_vm2, %v998_v32  ;;  %2190 = vmatmul.mubr.msk.f32.vlgmr.msra.gmra.mrb[8].mxu1 %vm146_vm1, %v1376_v33 }
0x15d4   :  { %2326 = vmatpush3.bf16.msra.mxu1 %v2936_v5  ;;  %2211 = vmatprep.mubr.msk.f32.mxu1 %vm2557_vm0, %v2558_v1 }
0x15d5   :  { %2327 = vmatprep.subr.bf16.mxu1 %v2556_v0 }
0x15d6   :  { %v1141_v53 = vpop.permute.xlu1 %1140  ;;  %v1528_v35 = vld [vmem:[#allocation7 + $0x6] sm:$0x3] }
0x15d7   :  { %1144 = vst.msk [vmem:[#allocation7 + $0xc] sm:$0x3] %vm285_vm2, %v1141_v53 }
0x15d8   :  { %2329 = vmatpush3.bf16.msra.mxu1 %v2942_v9 }
0x15d9   :  { %2336 = vmatprep.subr.bf16.mxu1 %v2556_v0 }
0x15da   :  { %v1252_v47 = vpop.permute.xlu1 %1251  ;;  %v1680_v37 = vld [vmem:[#allocation7 + $0xa] sm:$0x3] }
0x15db   :  { %2212 = vmatmul.mubr.msk.f32.vlgmr.msra.gmra.mrb[10].mxu1 %vm146_vm1, %v1528_v35  ;;  %v1254_v15 = vsub.f32 %v1248_v14, %v1252_v47 }
0x15dc   :  { %2338 = vmatpush3.bf16.msra.mxu1 %v2936_v5  ;;  %2233 = vmatprep.mubr.msk.f32.mxu1 %vm2557_vm0, %v2558_v1 }
0x15dd   :  { %v1260_v10 = vmul.f32 %v2960_v29, %v1254_v15  ;;  %2339 = vmatprep.subr.bf16.mxu1 %v2556_v0 }
0x15de   :  { %v1270_v36 = vpop.permute.xlu1 %1269  ;;  %v1756_v12 = vld [vmem:[#allocation7 + $0xc] sm:$0x3] }
0x15df   :  { %v1272_v13 = vadd.f32 %v1270_v36, %v2927_v54  ;;  %2245 = vmatmul.mubr.msk.f32.vlgmr.msra.gmra.mrb[14].mxu0 %vm146_vm1, %v1756_v12  ;;  %1262 = vrot.lane.b32.xlu0 %v1260_v10, %s2560_s28 }
0x15e0   :  { %2341 = vmatpush3.bf16.msra.mxu1 %v2942_v9 }
0x15e1   :  { %1289 = vst.msk [vmem:[#allocation10] sm:$0x3] %vm285_vm2, %v1272_v13  ;;  %2348 = vmatprep.subr.bf16.mxu1 %v2556_v0 }
0x15e3   :  { %2234 = vmatmul.mubr.msk.f32.vlgmr.msra.gmra.mrb[12].mxu1 %vm146_vm1, %v1680_v37 }
0x15e4   :  { %2350 = vmatpush3.bf16.msra.mxu1 %v2936_v5  ;;  %2255 = vmatprep.mubr.msk.f32.mxu1 %vm2557_vm0, %v2558_v1 }
0x15e5   :  { %2351 = vmatprep.subr.bf16.mxu1 %v2556_v0 }
0x15e8   :  { %2353 = vmatpush3.bf16.msra.mxu1 %v2942_v9 }
0x163d   :  { %v1284_v54 = vpop.permute.xlu0 %1283 }
0x163e   :  { %1287 = vst.msk [vmem:[#allocation7 + $0xe] sm:$0x3] %vm285_vm2, %v1284_v54 }
0x1645   :  { %v1832_v29 = vld [vmem:[#allocation7 + $0xe] sm:$0x3] }
0x1646   :  { %2256 = vmatmul.mubr.msk.f32.vlgmr.msra.gmra.mrb[14].mxu1 %vm146_vm1, %v1832_v29 }
0x1651   :  { %v1263_v38 = vpop.permute.xlu0 %1262 }
0x1652   :  { %v1265_v39 = vadd.f32 %v1263_v38, %v2920_v49 }
0x1654   :  { %1288 = vst.msk [vmem:[#allocation9] sm:$0x3] %vm285_vm2, %v1265_v39 }
0x1655   :  { %2468 = shalt.err (!%p2465_p12)
}
0x1656   :  { %s2469_s24 = scalar_lea.hbm %s3124_s10, 256 }
0x1657   :  { %p2470_p13 = scmp.ne.s32.totalorder %s3124_s10, %s2469_s24  ;;  %p2473_p0 = scmp.lt.u32.totalorder %s2469_s24, %s3124_s10 }
0x1659   :  { %p2475_p1 = pnand %p2473_p0, %p2470_p13 }
0x165b   :  { %2478 = shalt.err (!%p2475_p1)
}
0x165c   :  { %s2564_s29 = smov 2   ;;  %s2565_s30 = smov [#allocation9]  }
0x165d   :  { %1931 = dma.vmem_to_hbm [thread:$0]  %s1926_s14, 256, %s3124_s10, [#allocation8], %s2560_s28, %s2560_s28, %s2564_s29  }
0x165e   :  { %s1938_s13 = sshll.u32 %s2565_s30, 4  ;;  %s1939_s13 = int_to_ptr.vmem [resolvable:$true] %s1938_s13 }
0x165f   :  { %s2479_s4 = scalar_lea.vmem %s1939_s13, 32  ;;  %p2484_p3 = scmp.lt.s32.totalorder %s1939_s13, %s1939_s13 }
0x1660   :  { %p2480_p2 = scmp.ne.s32.totalorder %s1939_s13, %s2479_s4  ;;  %p2485_p4 = scmp.lt.s32.totalorder %s2479_s4, %s2479_s4 }
0x1662   :  { %p2486_p5 = por %p2485_p4, %p2484_p3 }
0x1664   :  { %p2487_p6 = pnand %p2486_p5, %p2480_p2 }
0x1666   :  { %2490 = shalt.err (!%p2487_p6)
}
0x1667   :  { %s2491_s17 = scalar_lea.hbm %s3125_s11, 32 }
0x1668   :  { %p2492_p7 = scmp.ne.s32.totalorder %s3125_s11, %s2491_s17  ;;  %p2495_p8 = scmp.lt.u32.totalorder %s2491_s17, %s3125_s11 }
0x166a   :  { %p2497_p9 = pnand %p2495_p8, %p2492_p7 }
0x166c   :  { %2500 = shalt.err (!%p2497_p9)
}
0x166d   :  { %1941 = dma.vmem_to_hbm [thread:$0]  %s1939_s13, 32, %s3125_s11, [#allocation8]  }
0x166e   :  { %s2566_s1 = smov [#allocation10]  }
0x166f   :  { %s1948_s21 = sshll.u32 %s2566_s1, 4  ;;  %s1949_s21 = int_to_ptr.vmem [resolvable:$true] %s1948_s21 }
0x1670   :  { %s2501_s8 = scalar_lea.vmem %s1949_s21, 32  ;;  %p2506_p11 = scmp.lt.s32.totalorder %s1949_s21, %s1949_s21 }
0x1671   :  { %p2502_p10 = scmp.ne.s32.totalorder %s1949_s21, %s2501_s8  ;;  %p2507_p12 = scmp.lt.s32.totalorder %s2501_s8, %s2501_s8 }
0x1673   :  { %p2508_p13 = por %p2507_p12, %p2506_p11 }
0x1675   :  { %p2509_p0 = pnand %p2508_p13, %p2502_p10 }
0x1677   :  { %2512 = shalt.err (!%p2509_p0)
}
0x1678   :  { %s2513_s22 = scalar_lea.hbm %s3126_s12, 32 }
0x1679   :  { %p2514_p1 = scmp.ne.s32.totalorder %s3126_s12, %s2513_s22  ;;  %p2517_p2 = scmp.lt.u32.totalorder %s2513_s22, %s3126_s12 }
0x167b   :  { %p2519_p3 = pnand %p2517_p2, %p2514_p1 }
0x167d   :  { %2522 = shalt.err (!%p2519_p3)
}
0x167e   :  { %1951 = dma.vmem_to_hbm [thread:$0]  %s1949_s21, 32, %s3126_s12, [#allocation11]  }
0x167f   :  { %s2567_s12 = smov [#allocation6]  }
0x1680   :  { %s1913_s5 = sshll.u32 %s2567_s12, 4  ;;  %s1914_s5 = int_to_ptr.vmem [resolvable:$true] %s1913_s5 }
0x1681   :  { %s2523_s2 = scalar_lea.vmem %s1914_s5, 256  ;;  %p2528_p5 = scmp.lt.s32.totalorder %s1914_s5, %s1914_s5 }
0x1682   :  { %p2524_p4 = scmp.ne.s32.totalorder %s1914_s5, %s2523_s2  ;;  %p2529_p6 = scmp.lt.s32.totalorder %s2523_s2, %s2523_s2 }
0x1684   :  { %p2530_p7 = por %p2529_p6, %p2528_p5 }
0x1686   :  { %p2531_p8 = pnand %p2530_p7, %p2524_p4 }
0x16a6   :  { %v1446_v0 = vpop.f32.mrb[8].mxu1 }
0x16a7   :  { %v1447_v1 = vadd.f32 %v2997_v63, %v1446_v0  ;;  %v2191_v49 = vpop.f32.mrb[9].mxu1 }
0x16a9   :  { %1451 = vst [vmem:[#allocation6 + $0x2] sm:$0x3] %v1447_v1 }
0x16ae   :  { %v1598_v5 = vpop.f32.mrb[10].mxu1 }
0x16af   :  { %v1599_v9 = vadd.f32 %v2997_v63, %v1598_v5  ;;  %v2213_v42 = vpop.f32.mrb[11].mxu1 }
0x16b1   :  { %1603 = vst [vmem:[#allocation6 + $0x6] sm:$0x3] %v1599_v9 }
0x16b2   :  { %v1826_v43 = vpop.f32.mrb[14].mxu0 }
0x16b3   :  { %v1827_v45 = vadd.f32 %v2997_v63, %v1826_v43  ;;  %v2246_v46 = vpop.f32.mrb[15].mxu0 }
0x16b5   :  { %1831 = vst [vmem:[#allocation6 + $0xc] sm:$0x3] %v1827_v45 }
0x16b6   :  { %v1750_v48 = vpop.f32.mrb[12].mxu1 }
0x16b7   :  { %v1751_v51 = vadd.f32 %v2997_v63, %v1750_v48  ;;  %v2235_v52 = vpop.f32.mrb[13].mxu1 }
0x16b9   :  { %1755 = vst [vmem:[#allocation6 + $0xa] sm:$0x3] %v1751_v51 }
0x1719   :  { %v1902_v55 = vpop.f32.mrb[14].mxu1 }
0x171a   :  { %v1903_v56 = vadd.f32 %v2997_v63, %v1902_v55  ;;  %v2257_v58 = vpop.f32.mrb[15].mxu1 }
0x171c   :  { %1907 = vst [vmem:[#allocation6 + $0xe] sm:$0x3] %v1903_v56 }
0x171d   :  { %2534 = shalt.err (!%p2531_p8)
}
0x171e   :  { %s2535_s13 = scalar_lea.hbm %s3123_s9, 256 }
0x171f   :  { %p2536_p9 = scmp.ne.s32.totalorder %s3123_s9, %s2535_s13  ;;  %p2539_p10 = scmp.lt.u32.totalorder %s2535_s13, %s3123_s9 }
0x1721   :  { %p2541_p11 = pnand %p2539_p10, %p2536_p9 }
0x1723   :  { %2544 = shalt.err (!%p2541_p11)
}
0x1724   :  { %1919 = dma.vmem_to_hbm [thread:$0]  %s1914_s5, 256, %s3123_s9, [#allocation5], %s2560_s28, %s2560_s28, %s2564_s29  }
0x1725   :  { %2547 = dma.done.wait [#allocation5], 256  }
0x1726   :  { %2548 = vsyncadd [#allocation5], 4294967040 }
0x1727   :  { %2549 = dma.done.wait [#allocation8], 288  }
0x1728   :  { %2550 = vsyncadd [#allocation8], 4294967008 }
0x1729   :  { %2551 = dma.done.wait [#allocation11], 32  }
0x172a   :  { %2552 = vsyncadd [#allocation11], 4294967264 }
0x172b   :  { %1964 = vsyncpa [#allocation4], 1 }
0x172c   :  { %1965 = vsyncpa [#allocation5], 1 }
0x172d   :  { %1966 = vsyncpa [#allocation8], 1 }
0x172e   :  { %1967 = vsyncpa [#allocation11], 1 }

</bundles_post_ra>
